<compile_context>
chip_gen: v6e
topology: v6e:2x2x1
jax: 0.10.0
libtpu: 0.0.40
codegen_flags: <defaults>
</compile_context>

<pallas_src>
import math
from functools import partial

import jax
import jax.numpy as jnp
from jax.experimental import pallas as pl
from jax.experimental.pallas import tpu as pltpu

L = 20  # module constant: number of covariance feature maps
S = 50  # module constant: number of function samples


# --------------------------------------------------------------------------
# tile pickers
# --------------------------------------------------------------------------
def _lane_tile(p, preferred=512):
    """Largest multiple of 128 that divides p and is <= preferred (else full p)."""
    if p % 128 != 0:
        return p
    t = min(preferred, p)
    t -= t % 128
    while t >= 128:
        if p % t == 0:
            return t
        t -= 128
    return p


def _s_tile(s, preferred=25):
    t = min(preferred, s)
    while t > 1:
        if s % t == 0:
            return t
        t -= 1
    return 1


# --------------------------------------------------------------------------
# Kernel 1 (fused): 1x1-conv Q-head  +  Gram covariance  +  exp-diag add.
# Grid iterates over P tiles; all N batch rows live in one block (the Gram is
# a cross-batch outer product, and N is small).
#
#   y[n,o,p]   = b[o] + sum_c w[o,c] x[n,c,p]                    (VPU FMAs)
#   cov[i,m,p] = sum_j y[i,1+j,p] y[m,1+j,p] / L                 (L-accumulated)
#   cov[i,i,p] += exp(y[i,1+L,p])                                (row stores)
#   diag[i,p]  = cov[i,i,p]   (after the add; consumed by the sampler)
# --------------------------------------------------------------------------
def head_gram_kernel(x_ref, w_ref, b_ref,
                     mean_ref, cov_ref, diag_ref, logvar_ref,
                     *, l_dim, inv_l):
    # x_ref: (N, C, TP)  w_ref: (Cout, C)  b_ref: (Cout, 1)
    # mean_ref/diag_ref/logvar_ref: (N, TP)   cov_ref: (N, N, TP)
    x = x_ref[...]
    w = w_ref[...]
    b = b_ref[...]
    n, c_in, _ = x.shape
    tp = x.shape[-1]

    # Depth-C (tiny) contraction done as broadcast FMAs on the VPU; the MXU is
    # deliberately not used for a contraction of depth C << 128.
    y = b[None, :, :] + w[None, :, 0:1] * x[:, 0:1, :]            # (N, Cout, TP)
    for c in range(1, c_in):
        y = y + w[None, :, c:c + 1] * x[:, c:c + 1, :]

    mean_ref[...] = y[:, 0, :]
    logvar_ref[...] = y[:, 2 + l_dim, :]
    diag_exp = jnp.exp(y[:, 1 + l_dim, :])                        # (N, TP)

    # Gram over the L covariance feature maps, accumulated over j so that the
    # (N, N, L, TP) broadcast intermediate is never materialized.
    cov = jnp.zeros((n, n, tp), jnp.float32)
    dgram = jnp.zeros((n, tp), jnp.float32)
    for j in range(l_dim):
        aj = y[:, 1 + j, :]                                       # (N, TP)
        cov = cov + aj[:, None, :] * aj[None, :, :]
        dgram = dgram + aj * aj

    diag_full = dgram * inv_l + diag_exp                          # (N, TP)
    diag_ref[...] = diag_full
    cov_ref[...] = cov * inv_l
    # q_cov[i, :, i] += exp(diag[i]) -> overwrite diagonal rows with a static
    # per-row loop (no iota/where masks, no full-tile selects).
    for i in range(n):
        cov_ref[i, i:i + 1, :] = diag_full[i:i + 1, :]


def q_head_gram(x_flat, w, b, *, lane_tile=512):
    n, c, p = x_flat.shape
    cout = w.shape[0]
    tp = _lane_tile(p, lane_tile)
    return pl.pallas_call(
        partial(head_gram_kernel, l_dim=L, inv_l=1.0 / L),
        out_shape=(
            jax.ShapeDtypeStruct((n, p), jnp.float32),            # q_mean
            jax.ShapeDtypeStruct((n, n, p), jnp.float32),         # cov (lane-dense)
            jax.ShapeDtypeStruct((n, p), jnp.float32),            # cov diagonal
            jax.ShapeDtypeStruct((n, p), jnp.float32),            # aleatoric logvar
        ),
        grid=(p // tp,),
        in_specs=[
            pl.BlockSpec((n, c, tp), lambda pi: (0, 0, pi)),
            pl.BlockSpec((cout, c), lambda pi: (0, 0)),           # VMEM-resident
            pl.BlockSpec((cout, 1), lambda pi: (0, 0)),
        ],
        out_specs=(
            pl.BlockSpec((n, tp), lambda pi: (0, pi)),
            pl.BlockSpec((n, n, tp), lambda pi: (0, 0, pi)),
            pl.BlockSpec((n, tp), lambda pi: (0, pi)),
            pl.BlockSpec((n, tp), lambda pi: (0, pi)),
        ),
        compiler_params=pltpu.CompilerParams(
            dimension_semantics=("parallel",)),
    )(x_flat, w, b)


# --------------------------------------------------------------------------
# Kernel 2: synthetic prior covariance (stand-in for f_prior_BNN):
#   cov[i,m,p] = sum_c x[i,c,p] x[m,c,p] / C  +  jitter * delta_im
# Same accumulate-over-channels / static-diag-store structure, tiled over P.
# --------------------------------------------------------------------------
def gram_jitter_kernel(x_ref, cov_ref, *, scale, jitter):
    x = x_ref[...]                                                # (N, C, TP)
    n, c_in, _ = x.shape
    tp = x.shape[-1]
    cov = jnp.zeros((n, n, tp), jnp.float32)
    dgram = jnp.zeros((n, tp), jnp.float32)
    for c in range(c_in):
        xc = x[:, c, :]                                           # (N, TP)
        cov = cov + xc[:, None, :] * xc[None, :, :]
        dgram = dgram + xc * xc
    cov_ref[...] = cov * scale
    diag_full = dgram * scale + jitter
    for i in range(n):
        cov_ref[i, i:i + 1, :] = diag_full[i:i + 1, :]


def prior_gram(x_flat, *, scale, jitter, lane_tile=512):
    n, c, p = x_flat.shape
    tp = _lane_tile(p, lane_tile)
    return pl.pallas_call(
        partial(gram_jitter_kernel, scale=scale, jitter=jitter),
        out_shape=jax.ShapeDtypeStruct((n, n, p), jnp.float32),
        grid=(p // tp,),
        in_specs=[pl.BlockSpec((n, c, tp), lambda pi: (0, 0, pi))],
        out_specs=pl.BlockSpec((n, n, tp), lambda pi: (0, 0, pi)),
        compiler_params=pltpu.CompilerParams(
            dimension_semantics=("parallel",)),
    )(x_flat)


# --------------------------------------------------------------------------
# Kernel 3: function sampling, tiled over (S, P).  Consumes only the (N_t, P)
# covariance diagonal (emitted by kernel 1), not the full (N_t, N_t, P) cov.
#   f[s,i,p] = mean[i,p] + sqrt(var[i,p]) * Z[s,i,p]
# --------------------------------------------------------------------------
def sample_kernel(mean_ref, var_ref, z_ref, o_ref):
    std = jnp.sqrt(var_ref[...])                                  # (Nt, TP)
    o_ref[...] = mean_ref[...][None, :, :] + std[None, :, :] * z_ref[...]


def sample_functions(q_mean_t, q_var_t, z, *, lane_tile=512, s_tile=25):
    s, n_t, p = z.shape
    tp = _lane_tile(p, lane_tile)
    ts = _s_tile(s, s_tile)
    return pl.pallas_call(
        sample_kernel,
        out_shape=jax.ShapeDtypeStruct((s, n_t, p), jnp.float32),
        grid=(s // ts, p // tp),
        in_specs=[
            pl.BlockSpec((n_t, tp), lambda si, pi: (0, pi)),
            pl.BlockSpec((n_t, tp), lambda si, pi: (0, pi)),
            pl.BlockSpec((ts, n_t, tp), lambda si, pi: (si, 0, pi)),
        ],
        out_specs=pl.BlockSpec((ts, n_t, tp), lambda si, pi: (si, 0, pi)),
        compiler_params=pltpu.CompilerParams(
            dimension_semantics=("parallel", "parallel")),
    )(q_mean_t, q_var_t, z)


# --------------------------------------------------------------------------
# FVI forward
# --------------------------------------------------------------------------
def fvi_forward(params, x_t, key, *, n_inducing, x_inducing_var, lane_tile=512):
    n_t, c, h, w_sp = x_t.shape
    p = h * w_sp
    k_noise, k_z = jax.random.split(key)

    # _generate_x_c: noisy clamped inducing inputs (plain-JAX glue)
    noise = math.sqrt(x_inducing_var) * jax.random.normal(
        k_noise, (n_inducing, c, h, w_sp), jnp.float32)
    x_c = jnp.clip(x_t[:n_inducing] + noise, 0.0, 1.0)

    x = jnp.concatenate([x_t, x_c], axis=0)                       # (N, C, H, W)
    n = x.shape[0]
    x_flat = x.reshape(n, c, p)                                   # (N, C, P)

    # TODO(synk): Q_FCDenseNet103_FVI is not defined in the provided source;
    # it is replaced by a single 1x1-conv head with the same 4-head interface,
    # fused with the covariance Gram / exp-diag computation in one kernel.
    q_mean, cov_nnp, cov_diag, q_logvar = q_head_gram(
        x_flat, params["w"], params["b"], lane_tile=lane_tile)

    # PyTorch API layout is (N, P, N); the kernels keep the lane-dense
    # (N, N, P) layout internally and we only transpose at the boundary.
    q_cov = jnp.transpose(cov_nnp, (0, 2, 1))                     # (N, P, N)
    lik_logvar = q_logvar[:n_t]                                   # (N_t, P)

    # _sample_functions on the training block: uses only the covariance diag.
    # TODO(synk): Z stays as an exact jax.random.normal draw in the wrapper;
    # on-chip pltpu PRNG generation would remove this HBM read on v6e/v7x.
    z = jax.random.normal(k_z, (S, n_t, p), jnp.float32)
    f_samples = sample_functions(q_mean[:n_t], cov_diag[:n_t], z,
                                 lane_tile=lane_tile)

    # TODO(synk): f_prior_BNN ('cnn_gp' Bayesian-CNN equivalent kernel) is not
    # defined in the provided source; replaced by a zero-mean per-pixel
    # inner-product kernel with a small jitter diagonal (same output shapes).
    prior_mean = jnp.zeros((n, p), jnp.float32)
    prior_cov_nnp = prior_gram(x_flat, scale=1.0 / c, jitter=1e-2,
                               lane_tile=lane_tile)
    prior_cov = jnp.transpose(prior_cov_nnp, (0, 2, 1))           # (N, P, N)

    return f_samples, lik_logvar, q_mean, q_cov, prior_mean, prior_cov


if __name__ == "__main__":
    key = jax.random.PRNGKey(0)
    k_x, k_w, k_b, k_fwd = jax.random.split(key, 4)

    # small shapes consistent with the module: batch N_t=2, C=4 channels,
    # 16x16 spatial; n_inducing=2 -> N = 4; P = 256
    N_t, C, H, W = 2, 4, 16, 16
    n_inducing = 2
    x_inducing_var = 0.1
    P = H * W
    N = N_t + n_inducing

    x_t = jax.random.uniform(k_x, (N_t, C, H, W), jnp.float32)

    Cout = 1 + L + 1 + 1  # q_mean | q_cov_out(L) | q_cov_out_diag | q_logvar
    params = {
        "w": 0.1 * jax.random.normal(k_w, (Cout, C), jnp.float32),
        "b": 0.01 * jax.random.normal(k_b, (Cout, 1), jnp.float32),
    }

    # lane_tile=128 forces multi-step grids even at this tiny demo size so the
    # tiled / pipelined path is exercised; the production default is 512.
    outs = fvi_forward(params, x_t, k_fwd, n_inducing=n_inducing,
                       x_inducing_var=x_inducing_var, lane_tile=128)
    outs = jax.block_until_ready(outs)
    f_samples, lik_logvar, q_mean, q_cov, prior_mean, prior_cov = outs

    assert f_samples.shape == (S, N_t, P)
    assert lik_logvar.shape == (N_t, P)
    assert q_mean.shape == (N, P)
    assert q_cov.shape == (N, P, N)
    assert prior_mean.shape == (N, P)
    assert prior_cov.shape == (N, P, N)

    # ---- pure-JAX reference check of every kernel output --------------------
    k_noise, k_z = jax.random.split(k_fwd)
    noise = math.sqrt(x_inducing_var) * jax.random.normal(
        k_noise, (n_inducing, C, H, W), jnp.float32)
    x_c = jnp.clip(x_t[:n_inducing] + noise, 0.0, 1.0)
    x_all = jnp.concatenate([x_t, x_c], axis=0).reshape(N, C, P)

    y_ref = jnp.einsum("oc,ncp->nop", params["w"], x_all) + params["b"][None]
    a_ref = y_ref[:, 1:1 + L, :]
    cov_ref = jnp.einsum("ijk,mjk->ikm", a_ref, a_ref) / L        # (N, P, N)
    diag_exp_ref = jnp.exp(y_ref[:, 1 + L, :])                    # (N, P)
    eye = jnp.eye(N, dtype=jnp.float32)
    cov_ref = cov_ref + diag_exp_ref[:, :, None] * eye[:, None, :]

    prior_ref = jnp.einsum("ick,mck->ikm", x_all, x_all) / C
    prior_ref = prior_ref + 1e-2 * eye[:, None, :]

    z_ref = jax.random.normal(k_z, (S, N_t, P), jnp.float32)
    var_ref = jnp.stack([cov_ref[i, :, i] for i in range(N_t)], axis=0)
    f_ref = y_ref[:N_t, 0, :][None] + jnp.sqrt(var_ref)[None] * z_ref

    tol = dict(atol=1e-4, rtol=1e-4)
    assert jnp.allclose(q_mean, y_ref[:, 0, :], **tol)
    assert jnp.allclose(lik_logvar, y_ref[:N_t, 2 + L, :], **tol)
    assert jnp.allclose(q_cov, cov_ref, **tol)
    assert jnp.allclose(prior_cov, prior_ref, **tol)
    assert jnp.allclose(f_samples, f_ref, **tol)
    assert bool(jnp.all(jnp.isfinite(f_samples)))
    assert bool(jnp.all(jnp.isfinite(q_cov)))

    print("KERNEL_OK")
</pallas_src>

<mosaic_0001>
module attributes {stable_mosaic.version = 11 : i64} {
  func.func @head_gram_kernel(%arg0: i32, %arg1: memref<4x4x128xf32, #tpu.memory_space<vmem>>, %arg2: memref<23x4xf32, #tpu.memory_space<vmem>>, %arg3: memref<23x1xf32, #tpu.memory_space<vmem>>, %arg4: memref<4x128xf32, #tpu.memory_space<vmem>>, %arg5: memref<4x4x128xf32, #tpu.memory_space<vmem>>, %arg6: memref<4x128xf32, #tpu.memory_space<vmem>>, %arg7: memref<4x128xf32, #tpu.memory_space<vmem>>) attributes {dimension_semantics = [#tpu.dimension_semantics<parallel>], iteration_bounds = array<i64: 2>, scalar_prefetch = 0 : i64, scratch_operands = 0 : i64, tpu.core_type = #tpu.core_type<tc>, window_params = [{transform_indices = @transform_0, window_bounds = array<i64: 4, 4, 128>}, {pipeline_mode = #tpu.pipeline_mode<synchronous>, transform_indices = @transform_1, window_bounds = array<i64: 23, 4>}, {pipeline_mode = #tpu.pipeline_mode<synchronous>, transform_indices = @transform_2, window_bounds = array<i64: 23, 1>}, {transform_indices = @transform_3, window_bounds = array<i64: 4, 128>}, {transform_indices = @transform_4, window_bounds = array<i64: 4, 4, 128>}, {transform_indices = @transform_5, window_bounds = array<i64: 4, 128>}, {transform_indices = @transform_6, window_bounds = array<i64: 4, 128>}]} {
    %c0 = arith.constant 0 : index
    %c0_0 = arith.constant 0 : index
    %c0_1 = arith.constant 0 : index
    %0 = vector.load %arg1[%c0, %c0_0, %c0_1] : memref<4x4x128xf32, #tpu.memory_space<vmem>>, vector<4x4x128xf32>
    %c0_2 = arith.constant 0 : index
    %c0_3 = arith.constant 0 : index
    %1 = vector.load %arg2[%c0_2, %c0_3] : memref<23x4xf32, #tpu.memory_space<vmem>>, vector<23x4xf32>
    %c0_4 = arith.constant 0 : index
    %c0_5 = arith.constant 0 : index
    %2 = vector.load %arg3[%c0_4, %c0_5] : memref<23x1xf32, #tpu.memory_space<vmem>>, vector<23x1xf32>
    %3 = vector.shape_cast %2 : vector<23x1xf32> to vector<1x23x1xf32>
    %4 = vector.extract_strided_slice %1 {offsets = [0, 0], sizes = [23, 1], strides = [1, 1]} : vector<23x4xf32> to vector<23x1xf32>
    %5 = vector.shape_cast %4 : vector<23x1xf32> to vector<1x23x1xf32>
    %6 = vector.extract_strided_slice %0 {offsets = [0, 0, 0], sizes = [4, 1, 128], strides = [1, 1, 1]} : vector<4x4x128xf32> to vector<4x1x128xf32>
    %7 = vector.broadcast %5 : vector<1x23x1xf32> to vector<4x23x128xf32>
    %8 = vector.broadcast %6 : vector<4x1x128xf32> to vector<4x23x128xf32>
    %9 = arith.mulf %7, %8 : vector<4x23x128xf32>
    %10 = vector.broadcast %3 : vector<1x23x1xf32> to vector<4x23x128xf32>
    %11 = arith.addf %10, %9 : vector<4x23x128xf32>
    %12 = vector.extract_strided_slice %1 {offsets = [0, 1], sizes = [23, 1], strides = [1, 1]} : vector<23x4xf32> to vector<23x1xf32>
    %13 = vector.shape_cast %12 : vector<23x1xf32> to vector<1x23x1xf32>
    %14 = vector.extract_strided_slice %0 {offsets = [0, 1, 0], sizes = [4, 1, 128], strides = [1, 1, 1]} : vector<4x4x128xf32> to vector<4x1x128xf32>
    %15 = vector.broadcast %13 : vector<1x23x1xf32> to vector<4x23x128xf32>
    %16 = vector.broadcast %14 : vector<4x1x128xf32> to vector<4x23x128xf32>
    %17 = arith.mulf %15, %16 : vector<4x23x128xf32>
    %18 = arith.addf %11, %17 : vector<4x23x128xf32>
    %19 = vector.extract_strided_slice %1 {offsets = [0, 2], sizes = [23, 1], strides = [1, 1]} : vector<23x4xf32> to vector<23x1xf32>
    %20 = vector.shape_cast %19 : vector<23x1xf32> to vector<1x23x1xf32>
    %21 = vector.extract_strided_slice %0 {offsets = [0, 2, 0], sizes = [4, 1, 128], strides = [1, 1, 1]} : vector<4x4x128xf32> to vector<4x1x128xf32>
    %22 = vector.broadcast %20 : vector<1x23x1xf32> to vector<4x23x128xf32>
    %23 = vector.broadcast %21 : vector<4x1x128xf32> to vector<4x23x128xf32>
    %24 = arith.mulf %22, %23 : vector<4x23x128xf32>
    %25 = arith.addf %18, %24 : vector<4x23x128xf32>
    %26 = vector.extract_strided_slice %1 {offsets = [0, 3], sizes = [23, 1], strides = [1, 1]} : vector<23x4xf32> to vector<23x1xf32>
    %27 = vector.shape_cast %26 : vector<23x1xf32> to vector<1x23x1xf32>
    %28 = vector.extract_strided_slice %0 {offsets = [0, 3, 0], sizes = [4, 1, 128], strides = [1, 1, 1]} : vector<4x4x128xf32> to vector<4x1x128xf32>
    %29 = vector.broadcast %27 : vector<1x23x1xf32> to vector<4x23x128xf32>
    %30 = vector.broadcast %28 : vector<4x1x128xf32> to vector<4x23x128xf32>
    %31 = arith.mulf %29, %30 : vector<4x23x128xf32>
    %32 = arith.addf %25, %31 : vector<4x23x128xf32>
    %33 = vector.extract_strided_slice %32 {offsets = [0, 0, 0], sizes = [4, 1, 128], strides = [1, 1, 1]} : vector<4x23x128xf32> to vector<4x1x128xf32>
    %34 = vector.shape_cast %33 : vector<4x1x128xf32> to vector<4x128xf32>
    %c0_6 = arith.constant 0 : index
    %c0_7 = arith.constant 0 : index
    %35 = vector.load %arg4[%c0_6, %c0_7] : memref<4x128xf32, #tpu.memory_space<vmem>>, vector<4x128xf32>
    tpu.vector_store %arg4[%c0_6, %c0_7], %34 {strides = array<i32>} : memref<4x128xf32, #tpu.memory_space<vmem>>, vector<4x128xf32>,
    %36 = vector.extract_strided_slice %32 {offsets = [0, 22, 0], sizes = [4, 1, 128], strides = [1, 1, 1]} : vector<4x23x128xf32> to vector<4x1x128xf32>
    %37 = vector.shape_cast %36 : vector<4x1x128xf32> to vector<4x128xf32>
    %c0_8 = arith.constant 0 : index
    %c0_9 = arith.constant 0 : index
    %38 = vector.load %arg7[%c0_8, %c0_9] : memref<4x128xf32, #tpu.memory_space<vmem>>, vector<4x128xf32>
    tpu.vector_store %arg7[%c0_8, %c0_9], %37 {strides = array<i32>} : memref<4x128xf32, #tpu.memory_space<vmem>>, vector<4x128xf32>,
    %39 = vector.extract_strided_slice %32 {offsets = [0, 21, 0], sizes = [4, 1, 128], strides = [1, 1, 1]} : vector<4x23x128xf32> to vector<4x1x128xf32>
    %40 = vector.shape_cast %39 : vector<4x1x128xf32> to vector<4x128xf32>
    %41 = math.exp %40 : vector<4x128xf32>
    %cst = arith.constant 0.000000e+00 : f32
    %42 = vector.broadcast %cst : f32 to vector<4x4x128xf32>
    %cst_10 = arith.constant 0.000000e+00 : f32
    %43 = vector.broadcast %cst_10 : f32 to vector<4x128xf32>
    %44 = vector.extract_strided_slice %32 {offsets = [0, 1, 0], sizes = [4, 1, 128], strides = [1, 1, 1]} : vector<4x23x128xf32> to vector<4x1x128xf32>
    %45 = vector.shape_cast %44 : vector<4x1x128xf32> to vector<4x128xf32>
    %46 = vector.shape_cast %45 : vector<4x128xf32> to vector<4x1x128xf32>
    %47 = vector.shape_cast %45 : vector<4x128xf32> to vector<1x4x128xf32>
    %48 = vector.broadcast %46 : vector<4x1x128xf32> to vector<4x4x128xf32>
    %49 = vector.broadcast %47 : vector<1x4x128xf32> to vector<4x4x128xf32>
    %50 = arith.mulf %48, %49 : vector<4x4x128xf32>
    %51 = arith.addf %42, %50 : vector<4x4x128xf32>
    %52 = arith.mulf %45, %45 : vector<4x128xf32>
    %53 = arith.addf %43, %52 : vector<4x128xf32>
    %54 = vector.extract_strided_slice %32 {offsets = [0, 2, 0], sizes = [4, 1, 128], strides = [1, 1, 1]} : vector<4x23x128xf32> to vector<4x1x128xf32>
    %55 = vector.shape_cast %54 : vector<4x1x128xf32> to vector<4x128xf32>
    %56 = vector.shape_cast %55 : vector<4x128xf32> to vector<4x1x128xf32>
    %57 = vector.shape_cast %55 : vector<4x128xf32> to vector<1x4x128xf32>
    %58 = vector.broadcast %56 : vector<4x1x128xf32> to vector<4x4x128xf32>
    %59 = vector.broadcast %57 : vector<1x4x128xf32> to vector<4x4x128xf32>
    %60 = arith.mulf %58, %59 : vector<4x4x128xf32>
    %61 = arith.addf %51, %60 : vector<4x4x128xf32>
    %62 = arith.mulf %55, %55 : vector<4x128xf32>
    %63 = arith.addf %53, %62 : vector<4x128xf32>
    %64 = vector.extract_strided_slice %32 {offsets = [0, 3, 0], sizes = [4, 1, 128], strides = [1, 1, 1]} : vector<4x23x128xf32> to vector<4x1x128xf32>
    %65 = vector.shape_cast %64 : vector<4x1x128xf32> to vector<4x128xf32>
    %66 = vector.shape_cast %65 : vector<4x128xf32> to vector<4x1x128xf32>
    %67 = vector.shape_cast %65 : vector<4x128xf32> to vector<1x4x128xf32>
    %68 = vector.broadcast %66 : vector<4x1x128xf32> to vector<4x4x128xf32>
    %69 = vector.broadcast %67 : vector<1x4x128xf32> to vector<4x4x128xf32>
    %70 = arith.mulf %68, %69 : vector<4x4x128xf32>
    %71 = arith.addf %61, %70 : vector<4x4x128xf32>
    %72 = arith.mulf %65, %65 : vector<4x128xf32>
    %73 = arith.addf %63, %72 : vector<4x128xf32>
    %74 = vector.extract_strided_slice %32 {offsets = [0, 4, 0], sizes = [4, 1, 128], strides = [1, 1, 1]} : vector<4x23x128xf32> to vector<4x1x128xf32>
    %75 = vector.shape_cast %74 : vector<4x1x128xf32> to vector<4x128xf32>
    %76 = vector.shape_cast %75 : vector<4x128xf32> to vector<4x1x128xf32>
    %77 = vector.shape_cast %75 : vector<4x128xf32> to vector<1x4x128xf32>
    %78 = vector.broadcast %76 : vector<4x1x128xf32> to vector<4x4x128xf32>
    %79 = vector.broadcast %77 : vector<1x4x128xf32> to vector<4x4x128xf32>
    %80 = arith.mulf %78, %79 : vector<4x4x128xf32>
    %81 = arith.addf %71, %80 : vector<4x4x128xf32>
    %82 = arith.mulf %75, %75 : vector<4x128xf32>
    %83 = arith.addf %73, %82 : vector<4x128xf32>
    %84 = vector.extract_strided_slice %32 {offsets = [0, 5, 0], sizes = [4, 1, 128], strides = [1, 1, 1]} : vector<4x23x128xf32> to vector<4x1x128xf32>
    %85 = vector.shape_cast %84 : vector<4x1x128xf32> to vector<4x128xf32>
    %86 = vector.shape_cast %85 : vector<4x128xf32> to vector<4x1x128xf32>
    %87 = vector.shape_cast %85 : vector<4x128xf32> to vector<1x4x128xf32>
    %88 = vector.broadcast %86 : vector<4x1x128xf32> to vector<4x4x128xf32>
    %89 = vector.broadcast %87 : vector<1x4x128xf32> to vector<4x4x128xf32>
    %90 = arith.mulf %88, %89 : vector<4x4x128xf32>
    %91 = arith.addf %81, %90 : vector<4x4x128xf32>
    %92 = arith.mulf %85, %85 : vector<4x128xf32>
    %93 = arith.addf %83, %92 : vector<4x128xf32>
    %94 = vector.extract_strided_slice %32 {offsets = [0, 6, 0], sizes = [4, 1, 128], strides = [1, 1, 1]} : vector<4x23x128xf32> to vector<4x1x128xf32>
    %95 = vector.shape_cast %94 : vector<4x1x128xf32> to vector<4x128xf32>
    %96 = vector.shape_cast %95 : vector<4x128xf32> to vector<4x1x128xf32>
    %97 = vector.shape_cast %95 : vector<4x128xf32> to vector<1x4x128xf32>
    %98 = vector.broadcast %96 : vector<4x1x128xf32> to vector<4x4x128xf32>
    %99 = vector.broadcast %97 : vector<1x4x128xf32> to vector<4x4x128xf32>
    %100 = arith.mulf %98, %99 : vector<4x4x128xf32>
    %101 = arith.addf %91, %100 : vector<4x4x128xf32>
    %102 = arith.mulf %95, %95 : vector<4x128xf32>
    %103 = arith.addf %93, %102 : vector<4x128xf32>
    %104 = vector.extract_strided_slice %32 {offsets = [0, 7, 0], sizes = [4, 1, 128], strides = [1, 1, 1]} : vector<4x23x128xf32> to vector<4x1x128xf32>
    %105 = vector.shape_cast %104 : vector<4x1x128xf32> to vector<4x128xf32>
    %106 = vector.shape_cast %105 : vector<4x128xf32> to vector<4x1x128xf32>
    %107 = vector.shape_cast %105 : vector<4x128xf32> to vector<1x4x128xf32>
    %108 = vector.broadcast %106 : vector<4x1x128xf32> to vector<4x4x128xf32>
    %109 = vector.broadcast %107 : vector<1x4x128xf32> to vector<4x4x128xf32>
    %110 = arith.mulf %108, %109 : vector<4x4x128xf32>
    %111 = arith.addf %101, %110 : vector<4x4x128xf32>
    %112 = arith.mulf %105, %105 : vector<4x128xf32>
    %113 = arith.addf %103, %112 : vector<4x128xf32>
    %114 = vector.extract_strided_slice %32 {offsets = [0, 8, 0], sizes = [4, 1, 128], strides = [1, 1, 1]} : vector<4x23x128xf32> to vector<4x1x128xf32>
    %115 = vector.shape_cast %114 : vector<4x1x128xf32> to vector<4x128xf32>
    %116 = vector.shape_cast %115 : vector<4x128xf32> to vector<4x1x128xf32>
    %117 = vector.shape_cast %115 : vector<4x128xf32> to vector<1x4x128xf32>
    %118 = vector.broadcast %116 : vector<4x1x128xf32> to vector<4x4x128xf32>
    %119 = vector.broadcast %117 : vector<1x4x128xf32> to vector<4x4x128xf32>
    %120 = arith.mulf %118, %119 : vector<4x4x128xf32>
    %121 = arith.addf %111, %120 : vector<4x4x128xf32>
    %122 = arith.mulf %115, %115 : vector<4x128xf32>
    %123 = arith.addf %113, %122 : vector<4x128xf32>
    %124 = vector.extract_strided_slice %32 {offsets = [0, 9, 0], sizes = [4, 1, 128], strides = [1, 1, 1]} : vector<4x23x128xf32> to vector<4x1x128xf32>
    %125 = vector.shape_cast %124 : vector<4x1x128xf32> to vector<4x128xf32>
    %126 = vector.shape_cast %125 : vector<4x128xf32> to vector<4x1x128xf32>
    %127 = vector.shape_cast %125 : vector<4x128xf32> to vector<1x4x128xf32>
    %128 = vector.broadcast %126 : vector<4x1x128xf32> to vector<4x4x128xf32>
    %129 = vector.broadcast %127 : vector<1x4x128xf32> to vector<4x4x128xf32>
    %130 = arith.mulf %128, %129 : vector<4x4x128xf32>
    %131 = arith.addf %121, %130 : vector<4x4x128xf32>
    %132 = arith.mulf %125, %125 : vector<4x128xf32>
    %133 = arith.addf %123, %132 : vector<4x128xf32>
    %134 = vector.extract_strided_slice %32 {offsets = [0, 10, 0], sizes = [4, 1, 128], strides = [1, 1, 1]} : vector<4x23x128xf32> to vector<4x1x128xf32>
    %135 = vector.shape_cast %134 : vector<4x1x128xf32> to vector<4x128xf32>
    %136 = vector.shape_cast %135 : vector<4x128xf32> to vector<4x1x128xf32>
    %137 = vector.shape_cast %135 : vector<4x128xf32> to vector<1x4x128xf32>
    %138 = vector.broadcast %136 : vector<4x1x128xf32> to vector<4x4x128xf32>
    %139 = vector.broadcast %137 : vector<1x4x128xf32> to vector<4x4x128xf32>
    %140 = arith.mulf %138, %139 : vector<4x4x128xf32>
    %141 = arith.addf %131, %140 : vector<4x4x128xf32>
    %142 = arith.mulf %135, %135 : vector<4x128xf32>
    %143 = arith.addf %133, %142 : vector<4x128xf32>
    %144 = vector.extract_strided_slice %32 {offsets = [0, 11, 0], sizes = [4, 1, 128], strides = [1, 1, 1]} : vector<4x23x128xf32> to vector<4x1x128xf32>
    %145 = vector.shape_cast %144 : vector<4x1x128xf32> to vector<4x128xf32>
    %146 = vector.shape_cast %145 : vector<4x128xf32> to vector<4x1x128xf32>
    %147 = vector.shape_cast %145 : vector<4x128xf32> to vector<1x4x128xf32>
    %148 = vector.broadcast %146 : vector<4x1x128xf32> to vector<4x4x128xf32>
    %149 = vector.broadcast %147 : vector<1x4x128xf32> to vector<4x4x128xf32>
    %150 = arith.mulf %148, %149 : vector<4x4x128xf32>
    %151 = arith.addf %141, %150 : vector<4x4x128xf32>
    %152 = arith.mulf %145, %145 : vector<4x128xf32>
    %153 = arith.addf %143, %152 : vector<4x128xf32>
    %154 = vector.extract_strided_slice %32 {offsets = [0, 12, 0], sizes = [4, 1, 128], strides = [1, 1, 1]} : vector<4x23x128xf32> to vector<4x1x128xf32>
    %155 = vector.shape_cast %154 : vector<4x1x128xf32> to vector<4x128xf32>
    %156 = vector.shape_cast %155 : vector<4x128xf32> to vector<4x1x128xf32>
    %157 = vector.shape_cast %155 : vector<4x128xf32> to vector<1x4x128xf32>
    %158 = vector.broadcast %156 : vector<4x1x128xf32> to vector<4x4x128xf32>
    %159 = vector.broadcast %157 : vector<1x4x128xf32> to vector<4x4x128xf32>
    %160 = arith.mulf %158, %159 : vector<4x4x128xf32>
    %161 = arith.addf %151, %160 : vector<4x4x128xf32>
    %162 = arith.mulf %155, %155 : vector<4x128xf32>
    %163 = arith.addf %153, %162 : vector<4x128xf32>
    %164 = vector.extract_strided_slice %32 {offsets = [0, 13, 0], sizes = [4, 1, 128], strides = [1, 1, 1]} : vector<4x23x128xf32> to vector<4x1x128xf32>
    %165 = vector.shape_cast %164 : vector<4x1x128xf32> to vector<4x128xf32>
    %166 = vector.shape_cast %165 : vector<4x128xf32> to vector<4x1x128xf32>
    %167 = vector.shape_cast %165 : vector<4x128xf32> to vector<1x4x128xf32>
    %168 = vector.broadcast %166 : vector<4x1x128xf32> to vector<4x4x128xf32>
    %169 = vector.broadcast %167 : vector<1x4x128xf32> to vector<4x4x128xf32>
    %170 = arith.mulf %168, %169 : vector<4x4x128xf32>
    %171 = arith.addf %161, %170 : vector<4x4x128xf32>
    %172 = arith.mulf %165, %165 : vector<4x128xf32>
    %173 = arith.addf %163, %172 : vector<4x128xf32>
    %174 = vector.extract_strided_slice %32 {offsets = [0, 14, 0], sizes = [4, 1, 128], strides = [1, 1, 1]} : vector<4x23x128xf32> to vector<4x1x128xf32>
    %175 = vector.shape_cast %174 : vector<4x1x128xf32> to vector<4x128xf32>
    %176 = vector.shape_cast %175 : vector<4x128xf32> to vector<4x1x128xf32>
    %177 = vector.shape_cast %175 : vector<4x128xf32> to vector<1x4x128xf32>
    %178 = vector.broadcast %176 : vector<4x1x128xf32> to vector<4x4x128xf32>
    %179 = vector.broadcast %177 : vector<1x4x128xf32> to vector<4x4x128xf32>
    %180 = arith.mulf %178, %179 : vector<4x4x128xf32>
    %181 = arith.addf %171, %180 : vector<4x4x128xf32>
    %182 = arith.mulf %175, %175 : vector<4x128xf32>
    %183 = arith.addf %173, %182 : vector<4x128xf32>
    %184 = vector.extract_strided_slice %32 {offsets = [0, 15, 0], sizes = [4, 1, 128], strides = [1, 1, 1]} : vector<4x23x128xf32> to vector<4x1x128xf32>
    %185 = vector.shape_cast %184 : vector<4x1x128xf32> to vector<4x128xf32>
    %186 = vector.shape_cast %185 : vector<4x128xf32> to vector<4x1x128xf32>
    %187 = vector.shape_cast %185 : vector<4x128xf32> to vector<1x4x128xf32>
    %188 = vector.broadcast %186 : vector<4x1x128xf32> to vector<4x4x128xf32>
    %189 = vector.broadcast %187 : vector<1x4x128xf32> to vector<4x4x128xf32>
    %190 = arith.mulf %188, %189 : vector<4x4x128xf32>
    %191 = arith.addf %181, %190 : vector<4x4x128xf32>
    %192 = arith.mulf %185, %185 : vector<4x128xf32>
    %193 = arith.addf %183, %192 : vector<4x128xf32>
    %194 = vector.extract_strided_slice %32 {offsets = [0, 16, 0], sizes = [4, 1, 128], strides = [1, 1, 1]} : vector<4x23x128xf32> to vector<4x1x128xf32>
    %195 = vector.shape_cast %194 : vector<4x1x128xf32> to vector<4x128xf32>
    %196 = vector.shape_cast %195 : vector<4x128xf32> to vector<4x1x128xf32>
    %197 = vector.shape_cast %195 : vector<4x128xf32> to vector<1x4x128xf32>
    %198 = vector.broadcast %196 : vector<4x1x128xf32> to vector<4x4x128xf32>
    %199 = vector.broadcast %197 : vector<1x4x128xf32> to vector<4x4x128xf32>
    %200 = arith.mulf %198, %199 : vector<4x4x128xf32>
    %201 = arith.addf %191, %200 : vector<4x4x128xf32>
    %202 = arith.mulf %195, %195 : vector<4x128xf32>
    %203 = arith.addf %193, %202 : vector<4x128xf32>
    %204 = vector.extract_strided_slice %32 {offsets = [0, 17, 0], sizes = [4, 1, 128], strides = [1, 1, 1]} : vector<4x23x128xf32> to vector<4x1x128xf32>
    %205 = vector.shape_cast %204 : vector<4x1x128xf32> to vector<4x128xf32>
    %206 = vector.shape_cast %205 : vector<4x128xf32> to vector<4x1x128xf32>
    %207 = vector.shape_cast %205 : vector<4x128xf32> to vector<1x4x128xf32>
    %208 = vector.broadcast %206 : vector<4x1x128xf32> to vector<4x4x128xf32>
    %209 = vector.broadcast %207 : vector<1x4x128xf32> to vector<4x4x128xf32>
    %210 = arith.mulf %208, %209 : vector<4x4x128xf32>
    %211 = arith.addf %201, %210 : vector<4x4x128xf32>
    %212 = arith.mulf %205, %205 : vector<4x128xf32>
    %213 = arith.addf %203, %212 : vector<4x128xf32>
    %214 = vector.extract_strided_slice %32 {offsets = [0, 18, 0], sizes = [4, 1, 128], strides = [1, 1, 1]} : vector<4x23x128xf32> to vector<4x1x128xf32>
    %215 = vector.shape_cast %214 : vector<4x1x128xf32> to vector<4x128xf32>
    %216 = vector.shape_cast %215 : vector<4x128xf32> to vector<4x1x128xf32>
    %217 = vector.shape_cast %215 : vector<4x128xf32> to vector<1x4x128xf32>
    %218 = vector.broadcast %216 : vector<4x1x128xf32> to vector<4x4x128xf32>
    %219 = vector.broadcast %217 : vector<1x4x128xf32> to vector<4x4x128xf32>
    %220 = arith.mulf %218, %219 : vector<4x4x128xf32>
    %221 = arith.addf %211, %220 : vector<4x4x128xf32>
    %222 = arith.mulf %215, %215 : vector<4x128xf32>
    %223 = arith.addf %213, %222 : vector<4x128xf32>
    %224 = vector.extract_strided_slice %32 {offsets = [0, 19, 0], sizes = [4, 1, 128], strides = [1, 1, 1]} : vector<4x23x128xf32> to vector<4x1x128xf32>
    %225 = vector.shape_cast %224 : vector<4x1x128xf32> to vector<4x128xf32>
    %226 = vector.shape_cast %225 : vector<4x128xf32> to vector<4x1x128xf32>
    %227 = vector.shape_cast %225 : vector<4x128xf32> to vector<1x4x128xf32>
    %228 = vector.broadcast %226 : vector<4x1x128xf32> to vector<4x4x128xf32>
    %229 = vector.broadcast %227 : vector<1x4x128xf32> to vector<4x4x128xf32>
    %230 = arith.mulf %228, %229 : vector<4x4x128xf32>
    %231 = arith.addf %221, %230 : vector<4x4x128xf32>
    %232 = arith.mulf %225, %225 : vector<4x128xf32>
    %233 = arith.addf %223, %232 : vector<4x128xf32>
    %234 = vector.extract_strided_slice %32 {offsets = [0, 20, 0], sizes = [4, 1, 128], strides = [1, 1, 1]} : vector<4x23x128xf32> to vector<4x1x128xf32>
    %235 = vector.shape_cast %234 : vector<4x1x128xf32> to vector<4x128xf32>
    %236 = vector.shape_cast %235 : vector<4x128xf32> to vector<4x1x128xf32>
    %237 = vector.shape_cast %235 : vector<4x128xf32> to vector<1x4x128xf32>
    %238 = vector.broadcast %236 : vector<4x1x128xf32> to vector<4x4x128xf32>
    %239 = vector.broadcast %237 : vector<1x4x128xf32> to vector<4x4x128xf32>
    %240 = arith.mulf %238, %239 : vector<4x4x128xf32>
    %241 = arith.addf %231, %240 : vector<4x4x128xf32>
    %242 = arith.mulf %235, %235 : vector<4x128xf32>
    %243 = arith.addf %233, %242 : vector<4x128xf32>
    %cst_11 = arith.constant 5.000000e-02 : f32
    %244 = vector.broadcast %cst_11 : f32 to vector<4x128xf32>
    %245 = arith.mulf %243, %244 : vector<4x128xf32>
    %246 = arith.addf %245, %41 : vector<4x128xf32>
    %c0_12 = arith.constant 0 : index
    %c0_13 = arith.constant 0 : index
    %247 = vector.load %arg6[%c0_12, %c0_13] : memref<4x128xf32, #tpu.memory_space<vmem>>, vector<4x128xf32>
    tpu.vector_store %arg6[%c0_12, %c0_13], %246 {strides = array<i32>} : memref<4x128xf32, #tpu.memory_space<vmem>>, vector<4x128xf32>,
    %cst_14 = arith.constant 5.000000e-02 : f32
    %248 = vector.broadcast %cst_14 : f32 to vector<4x4x128xf32>
    %249 = arith.mulf %241, %248 : vector<4x4x128xf32>
    %c0_15 = arith.constant 0 : index
    %c0_16 = arith.constant 0 : index
    %c0_17 = arith.constant 0 : index
    %250 = vector.load %arg5[%c0_15, %c0_16, %c0_17] : memref<4x4x128xf32, #tpu.memory_space<vmem>>, vector<4x4x128xf32>
    tpu.vector_store %arg5[%c0_15, %c0_16, %c0_17], %249 {strides = array<i32>} : memref<4x4x128xf32, #tpu.memory_space<vmem>>, vector<4x4x128xf32>,
    %251 = vector.extract_strided_slice %246 {offsets = [0, 0], sizes = [1, 128], strides = [1, 1]} : vector<4x128xf32> to vector<1x128xf32>
    %c0_18 = arith.constant 0 : index
    %c0_19 = arith.constant 0 : index
    %c0_20 = arith.constant 0 : index
    %252 = vector.load %arg5[%c0_18, %c0_19, %c0_20] : memref<4x4x128xf32, #tpu.memory_space<vmem>>, vector<1x1x128xf32>
    %253 = vector.shape_cast %252 : vector<1x1x128xf32> to vector<1x128xf32>
    %254 = vector.shape_cast %251 : vector<1x128xf32> to vector<1x1x128xf32>
    tpu.vector_store %arg5[%c0_18, %c0_19, %c0_20], %254 {strides = array<i32>} : memref<4x4x128xf32, #tpu.memory_space<vmem>>, vector<1x1x128xf32>,
    %255 = vector.extract_strided_slice %246 {offsets = [1, 0], sizes = [1, 128], strides = [1, 1]} : vector<4x128xf32> to vector<1x128xf32>
    %c1 = arith.constant 1 : index
    %c1_21 = arith.constant 1 : index
    %c0_22 = arith.constant 0 : index
    %256 = vector.load %arg5[%c1, %c1_21, %c0_22] : memref<4x4x128xf32, #tpu.memory_space<vmem>>, vector<1x1x128xf32>
    %257 = vector.shape_cast %256 : vector<1x1x128xf32> to vector<1x128xf32>
    %258 = vector.shape_cast %255 : vector<1x128xf32> to vector<1x1x128xf32>
    tpu.vector_store %arg5[%c1, %c1_21, %c0_22], %258 {strides = array<i32>} : memref<4x4x128xf32, #tpu.memory_space<vmem>>, vector<1x1x128xf32>,
    %259 = vector.extract_strided_slice %246 {offsets = [2, 0], sizes = [1, 128], strides = [1, 1]} : vector<4x128xf32> to vector<1x128xf32>
    %c2 = arith.constant 2 : index
    %c2_23 = arith.constant 2 : index
    %c0_24 = arith.constant 0 : index
    %260 = vector.load %arg5[%c2, %c2_23, %c0_24] : memref<4x4x128xf32, #tpu.memory_space<vmem>>, vector<1x1x128xf32>
    %261 = vector.shape_cast %260 : vector<1x1x128xf32> to vector<1x128xf32>
    %262 = vector.shape_cast %259 : vector<1x128xf32> to vector<1x1x128xf32>
    tpu.vector_store %arg5[%c2, %c2_23, %c0_24], %262 {strides = array<i32>} : memref<4x4x128xf32, #tpu.memory_space<vmem>>, vector<1x1x128xf32>,
    %263 = vector.extract_strided_slice %246 {offsets = [3, 0], sizes = [1, 128], strides = [1, 1]} : vector<4x128xf32> to vector<1x128xf32>
    %c3 = arith.constant 3 : index
    %c3_25 = arith.constant 3 : index
    %c0_26 = arith.constant 0 : index
    %264 = vector.load %arg5[%c3, %c3_25, %c0_26] : memref<4x4x128xf32, #tpu.memory_space<vmem>>, vector<1x1x128xf32>
    %265 = vector.shape_cast %264 : vector<1x1x128xf32> to vector<1x128xf32>
    %266 = vector.shape_cast %263 : vector<1x128xf32> to vector<1x1x128xf32>
    tpu.vector_store %arg5[%c3, %c3_25, %c0_26], %266 {strides = array<i32>} : memref<4x4x128xf32, #tpu.memory_space<vmem>>, vector<1x1x128xf32>,
    return
  }
  func.func @transform_0(%arg0: i32) -> (i32, i32, i32) {
    %c0_i32 = arith.constant 0 : i32
    %c0_i32_0 = arith.constant 0 : i32
    %c0_i32_1 = arith.constant 0 : i32
    return %c0_i32, %c0_i32_0, %arg0 : i32, i32, i32
  }
  func.func @transform_1(%arg0: i32) -> (i32, i32) {
    %c0_i32 = arith.constant 0 : i32
    %c0_i32_0 = arith.constant 0 : i32
    %c0_i32_1 = arith.constant 0 : i32
    return %c0_i32, %c0_i32_0 : i32, i32
  }
  func.func @transform_2(%arg0: i32) -> (i32, i32) {
    %c0_i32 = arith.constant 0 : i32
    %c0_i32_0 = arith.constant 0 : i32
    %c0_i32_1 = arith.constant 0 : i32
    return %c0_i32, %c0_i32_0 : i32, i32
  }
  func.func @transform_3(%arg0: i32) -> (i32, i32) {
    %c0_i32 = arith.constant 0 : i32
    %c0_i32_0 = arith.constant 0 : i32
    return %c0_i32, %arg0 : i32, i32
  }
  func.func @transform_4(%arg0: i32) -> (i32, i32, i32) {
    %c0_i32 = arith.constant 0 : i32
    %c0_i32_0 = arith.constant 0 : i32
    %c0_i32_1 = arith.constant 0 : i32
    return %c0_i32, %c0_i32_0, %arg0 : i32, i32, i32
  }
  func.func @transform_5(%arg0: i32) -> (i32, i32) {
    %c0_i32 = arith.constant 0 : i32
    %c0_i32_0 = arith.constant 0 : i32
    return %c0_i32, %arg0 : i32, i32
  }
  func.func @transform_6(%arg0: i32) -> (i32, i32) {
    %c0_i32 = arith.constant 0 : i32
    %c0_i32_0 = arith.constant 0 : i32
    return %c0_i32, %arg0 : i32, i32
  }
}

</mosaic_0001>

<bundles_post_ra>
// kernel: tpu_custom_call.1
= control target key start
LH: loop header
LB: loop body
LE: loop exit
PB: predicated region body
PF: predicated region fallthrough
CT: control target
= control target key end

     0   :  { %s2938_s0 = inlined_call_operand.vmem [shape: f32[4,4,256], index: 0, kind: input, shape index: {}]   ;;  %s2939_s1 = inlined_call_operand.vmem [shape: f32[23,4], index: 1, kind: input, shape index: {}]   ;;  %s2940_s2 = inlined_call_operand.vmem [shape: f32[23,1], index: 2, kind: input, shape index: {}]   ;;  %s2941_s3 = inlined_call_operand.hbm [shape: f32[4,256], index: 3, kind: output, shape index: {0}]   ;;  %s2942_s4 = inlined_call_operand.hbm [shape: f32[4,4,256], index: 4, kind: output, shape index: {1}]   ;;  %s2943_s5 = inlined_call_operand.hbm [shape: f32[4,256], index: 5, kind: output, shape index: {2}]   ;;  %s2944_s6 = inlined_call_operand.hbm [shape: f32[4,256], index: 6, kind: output, shape index: {3}]  }
   0x1   :  { %2957 = sst [smem:[#allocation20_spill]] %s2938_s0 }
   0x2   :  { %2958 = sst [smem:[#allocation21_spill]] %s2939_s1 }
   0x3   :  { %2959 = sst [smem:[#allocation22_spill]] %s2940_s2 }
   0x4   :  { %12 = vsyncpa [#allocation4], 0 }
   0x5   :  { %14 = vsyncpa [#allocation4 + $0x1], 0 }
   0x6   :  { %15 = vsyncpa [#allocation6], 0 }
   0x7   :  { %17 = vsyncpa [#allocation6 + $0x1], 0 }
   0x8   :  { %18 = vsyncpa [#allocation9], 0 }
   0x9   :  { %20 = vsyncpa [#allocation9 + $0x1], 0  ;;  %s2053_s21 = smov 0   ;;  %s2055_s22 = smov 0  }
   0xa   :  { %s2057_s23 = smov 0   ;;  %s2059_s24 = smov 0  }
   0xb LB: > { %2960 = sst [smem:[#allocation13_spill]] %s2001_s23  ;;  %s2074_s25 = sadd.s32 4294967295, %s2005_s24   ;;  %s2005_s24 = sphi %s2059_s24, %s2989_s24   ;;  %s2001_s23 = sphi %s2057_s23, %s2986_s23   ;;  %s1997_s22 = sphi %s2055_s22, %s2988_s22   ;;  %s1993_s21 = sphi %s2053_s21, %s2987_s21  }
   0xc   : > { %s2953_s26 = sadd.s32 4294967294, %s2005_s24   ;;  %s2078_s27 = sadd.s32 1, %s2005_s24  }
   0xd   : > { %s33_s28 = sadd.s32 1, %s2001_s23  ;;  %s30_s29 = ssub.s32 %s2005_s24, %s2078_s27 }
   0xe   : > { %p40_p0 = scmp.ne.s32.totalorder %s2001_s23, %s1997_s22  ;;  %p31_p1 = scmp.eq.s32.totalorder %s30_s29, 0 }
   0xf   : > { %p41_p2 = scmp.eq.s32.totalorder %s2005_s24, 0  ;;  %p112_p3 = scmp.eq.s32.totalorder %s2074_s25, 1 }
  0x10   : > { %p117_p4 = scmp.ne.s32.totalorder %s1997_s22, %s1993_s21  ;;  %p118_p7 = scmp.eq.s32.totalorder %s2953_s26, 1 }
  0x11   : > { %s2090_s30 = scalar_select %p31_p1, %s2001_s23, %s33_s28  }
  0x12   : > { %p42_p5 = por %p41_p2, %p40_p0  ;;  %p2092_p6 = por %p112_p3, %p40_p0 }
  0x13   : > { %2961 = sst [smem:[#allocation14_spill]] %s2090_s30  ;;  %p2098_p8 = por %p118_p7, %p117_p4 }
  0x14   : > { %p1754_p9 = scmp.ge.s32.totalorder %s2005_s24, 2 }
  0x16   : > { %218 = sbr.rel (%p1754_p9) target bundleno = 39 (0x27), region = 24 }
  0x1b   : > { %221 = sbr.rel (!%p42_p5) target bundleno = 39 (0x27), region = 28  ;;  %s223_s9 = sand.u32 (%p42_p5), 1, %s2001_s23  }
  0x1c   : > { %s1756_s10 = sshll.u32 (%p42_p5), %s2005_s24, 2  ;;  %s1755_s11 = sshll.u32 (%p42_p5), %s223_s9, 4 }
  0x1d   : > { %s2964_s0 = sld [smem:[#allocation20_spill]] (%p42_p5)  ;;  %s225_s15 = scalar_lea.vmem (%p42_p5), [#allocation2], %s1755_s11 }
  0x23   : > { %s227_s14 = scalar_lea.vmem %s2964_s0, %s1756_s10 }
  0x24   : > { %v244_v0 = vld [vmem:[%s227_s14] sm:$0xf]  ;;  %v246_v1 = vld [vmem:[%s227_s14 + $0x8] sm:$0xf]  ;;  %v248_v2 = vld [vmem:[%s227_s14 + $0x10] sm:$0xf] }
  0x25   : > { %245 = vst [vmem:[%s225_s15] sm:$0xf] %v244_v0  ;;  %247 = vst [vmem:[%s225_s15 + $0x4] sm:$0xf] %v246_v1  ;;  %v250_v3 = vld [vmem:[%s227_s14 + $0x18] sm:$0xf] }
  0x26   : > { %249 = vst [vmem:[%s225_s15 + $0x8] sm:$0xf] %v248_v2  ;;  %251 = vst [vmem:[%s225_s15 + $0xc] sm:$0xf] %v250_v3 }
  0x27 PF: > { %p1757_p10 = scmp.ge.s32.totalorder %s2005_s24, 1  ;;  %p282_p11 = scmp.lt.s32.totalorder %s2005_s24, 3 }
  0x29   : > { %p283_p12 = pnand %p1757_p10, %p282_p11 }
  0x2b   : > { %286 = sbr.rel (%p283_p12) target bundleno = 429 (0x1ad), region = 69 }
  0x30   : > { %s2965_s1 = sld [smem:[#allocation21_spill]]  ;;  %v2007_v5 = vmov 1   ;;  %v2008_v6 = vmov 0   ;;  %v2009_v8 = vmov 2   ;;  %v2010_v10 = vmov 3   ;;  %s2131_s14 = sand.u32 1, %s1997_s22  }
  0x31   : > { %1838 = vset.pattern.permute.xlu1 %v2007_v5  ;;  %1837 = vset.pattern.permute.xlu0 %v2008_v6  ;;  %s2966_s2 = sld [smem:[#allocation22_spill]]  ;;  %v358_v14 = vlaneseq  ;;  %s1758_s15 = sshll.u32 %s2131_s14, 4  ;;  %vm574_vm0 = vcmask 1041409   ;;  %vm577_vm1 = vcmask 1042434   ;;  %vm580_vm2 = vcmask 1043459  }
  0x32   : > { %s291_s16 = scalar_lea.vmem [#allocation2], %s1758_s15  ;;  %s2720_s17 = sshll.u32 %s2131_s14, 2  ;;  %vm1505_vm3 = vcmask 1044484   ;;  %vm589_vm4 = vcmask 1047559  }
  0x33   : > { %v2134_v15 = vshrl.u32 %v358_v14, 7  ;;  %v333_v18 = vld [vmem:[%s291_s16] sm:$0xf]  ;;  %v334_v19 = vld [vmem:[%s291_s16 + $0x4] sm:$0xf]  ;;  %s2729_s19 = scalar_lea.vmem [#allocation5], %s1758_s15 }
  0x34   : > { %v335_v20 = vld [vmem:[%s291_s16 + $0x8] sm:$0xf]  ;;  %v336_v21 = vld [vmem:[%s291_s16 + $0xc] sm:$0xf]  ;;  %s1565_s20 = sshll.u32 %s2729_s19, 4  ;;  %s2740_s28 = sshll.u32 %s2074_s25, 6  ;;  %s2759_s20 = int_to_ptr.vmem [resolvable:$true] %s1565_s20 }
  0x35   : > { %v2137_v16 = vsub.s32 0, %v2134_v15  ;;  %v2140_v17 = vsub.s32 1, %v2134_v15  ;;  %v2145_v22 = vsub.s32 2, %v2134_v15  ;;  %v2160_v27 = vsub.s32 3, %v2134_v15  ;;  %s2749_s29 = scalar_lea.vmem [#allocation8], %s2720_s17  ;;  %s2954_s9 = scalar_lea.vmem [#allocation3], %s2720_s17 }
  0x36   : > { %v337_v4 = vld [vmem:[%s2965_s1] sm:$0xff]  ;;  %v338_v9 = vld [vmem:[%s2965_s1 + $0x8] sm:$0xff]  ;;  %v339_v12 = vld [vmem:[%s2965_s1 + $0x10] sm:$0x7f]  ;;  %s1553_s10 = sshll.u32 %s2954_s9, 4  ;;  %s1594_s11 = sshll.u32 %s2749_s29, 4  ;;  %s2785_s10 = int_to_ptr.vmem [resolvable:$true] %s1553_s10  ;;  %s2804_s11 = int_to_ptr.vmem [resolvable:$true] %s1594_s11 }
  0x37   : > { %414 = vperm.xlu1 %1838, %v337_v4   ;;  %345 = vperm.xlu0 %1837, %v337_v4   ;;  %v340_v7 = vld [vmem:[%s2966_s2] sm:$0xff]  ;;  %v341_v11 = vld [vmem:[%s2966_s2 + $0x8] sm:$0xff]  ;;  %v342_v13 = vld [vmem:[%s2966_s2 + $0x10] sm:$0x7f]  ;;  %2967 = vst [vmem:[#allocation15_spill] sm:$0xff] %v2140_v17  ;;  %v2148_v23 = vrot.slane %v333_v18, %v2137_v16  ;;  %v2151_v24 = vrot.slane %v334_v19, %v2137_v16  ;;  %s2767_s15 = scalar_lea.hbm %s2942_s4, %s2740_s28  ;;  %s2777_s9 = scalar_lea.hbm %s2941_s3, %s2740_s28 }
  0x38   : > { %2968 = vst [vmem:[#allocation16_spill] sm:$0xff] %v2145_v22  ;;  %v2154_v25 = vrot.slane %v335_v20, %v2137_v16  ;;  %v2157_v26 = vrot.slane %v336_v21, %v2137_v16  ;;  %2969 = vst [vmem:[#allocation17_spill] sm:$0xff] %v2160_v27  ;;  %v2163_v29 = vrot.slane %v333_v18, %v2140_v17  ;;  %s2955_s18 = scalar_lea.vmem [#allocation7], %s2720_s17  ;;  %s2800_s16 = scalar_lea.hbm %s2944_s6, %s2740_s28 }
  0x39   : > { %v2166_v30 = vrot.slane %v334_v19, %v2140_v17  ;;  %v2169_v31 = vrot.slane %v335_v20, %v2140_v17  ;;  %v2172_v32 = vrot.slane %v336_v21, %v2140_v17  ;;  %v2175_v34 = vrot.slane %v333_v18, %v2145_v22  ;;  %s1581_s12 = sshll.u32 %s2955_s18, 4  ;;  %s2815_s1 = scalar_lea.hbm %s2943_s5, %s2740_s28  ;;  %s2817_s12 = int_to_ptr.vmem [resolvable:$true] %s1581_s12 }
  0x3a   : > { %v2178_v35 = vrot.slane %v334_v19, %v2145_v22  ;;  %v2181_v36 = vrot.slane %v335_v20, %v2145_v22  ;;  %v2184_v37 = vrot.slane %v336_v21, %v2145_v22  ;;  %v2191_v42 = vrot.slane %v333_v18, %v2160_v27  ;;  %s2981_s26 = sand.u32 1, %s2074_s25   ;;  %s1859_s13 = scalar_lea.vmem %s2759_s20, 256 }
  0x3b   : > { %1839 = vset.pattern.permute.xlu1 %v2009_v8  ;;  %388 = vperm.xlu0 %1837, %v340_v7   ;;  %v2194_v43 = vrot.slane %v334_v19, %v2160_v27  ;;  %v2197_v44 = vrot.slane %v335_v20, %v2160_v27  ;;  %v2200_v45 = vrot.slane %v336_v21, %v2160_v27  ;;  %p1860_p13 = scmp.ne.s32.totalorder %s2759_s20, %s1859_s13  ;;  %s2011_s2 = smov [#allocation5]  }
  0x3c   : > { %466 = vperm.xlu1 %1839, %v337_v4   ;;  %s1863_s30 = sshll.u32 %s2011_s2, 4  ;;  %s1864_s30 = int_to_ptr.vmem [resolvable:$false] %s1863_s30 }
  0x3d   : > { %p1861_p0 = pnand %p1860_p13, %p2092_p6  ;;  %s1865_s0 = scalar_lea.vmem %s1864_s30, 512 }
  0x3e   : > { %p1866_p2 = scmp.lt.s32.totalorder %s2759_s20, %s1864_s30  ;;  %p1867_p3 = scmp.lt.s32.totalorder %s1865_s0, %s1859_s13 }
  0x3f   : > { %1840 = vset.pattern.permute.xlu0 %v2010_v10  ;;  %p1862_p1 = pneg %p1861_p0 }
  0x40   : > { %1841 = vset.pattern.permute.xlu1 %v2008_v6  ;;  %518 = vperm.xlu0 %1840, %v337_v4   ;;  %p1868_p4 = por %p1867_p3, %p1866_p2 }
  0x41   : > { %350 = vperm.xlu1 %1841, %v338_v9  }
  0x42   : > { %p1869_p5 = pnand %p1868_p4, %p1862_p1 }
  0x44   : > { %1842 = vset.pattern.permute.xlu0 %v2007_v5 }
  0x45   : > { %393 = vperm.xlu1 %1841, %v341_v11   ;;  %418 = vperm.xlu0 %1842, %v338_v9   ;;  %v2218_v11 = vsub.s32 5, %v2134_v15 }
  0x49   : > { %1843 = vset.pattern.permute.xlu1 %v2009_v8  ;;  %1845 = vset.pattern.permute.xlu0 %v2008_v6 }
  0x4a   : > { %470 = vperm.xlu1 %1843, %v338_v9   ;;  %355 = vperm.xlu0 %1845, %v339_v12  }
  0x4e   : > { %1844 = vset.pattern.permute.xlu1 %v2010_v10  ;;  %1848 = vset.pattern.permute.xlu0 %v2009_v8 }
  0x4f   : > { %522 = vperm.xlu1 %1844, %v338_v9   ;;  %474 = vperm.xlu0 %1848, %v339_v12  }
  0x53   : > { %1846 = vset.pattern.permute.xlu1 %v2008_v6  ;;  %1850 = vset.pattern.permute.xlu0 %v2010_v10 }
  0x54   : > { %398 = vperm.xlu1 %1846, %v342_v13   ;;  %v2224_v13 = vsub.s32 7, %v2134_v15 }
  0x58   : > { %1847 = vset.pattern.permute.xlu1 %v2007_v5 }
  0x59   : > { %422 = vperm.xlu1 %1847, %v339_v12  }
  0x5d   : > { %1849 = vset.pattern.permute.xlu1 %v2010_v10  ;;  %v2215_v10 = vsub.s32 4, %v2134_v15 }
  0x5e   : > { %526 = vperm.xlu1 %1849, %v339_v12   ;;  %v2221_v12 = vsub.s32 6, %v2134_v15 }
  0xb2   : > { %v415_v28 = vpop.permute.xlu1 %414  ;;  %v346_v33 = vpop.permute.xlu0 %345 }
  0xb3   : > { %v374_v38 = vmul.f32 %v2148_v23, %v346_v33  ;;  %v377_v39 = vmul.f32 %v2151_v24, %v346_v33  ;;  %v380_v40 = vmul.f32 %v2154_v25, %v346_v33  ;;  %v383_v41 = vmul.f32 %v2157_v26, %v346_v33 }
  0xb4   : > { %v441_v46 = vmul.f32 %v2163_v29, %v415_v28  ;;  %v444_v47 = vmul.f32 %v2166_v30, %v415_v28  ;;  %v447_v48 = vmul.f32 %v2169_v31, %v415_v28  ;;  %v450_v49 = vmul.f32 %v2172_v32, %v415_v28 }
  0xb6   : > { %v389_v50 = vpop.permute.xlu0 %388 }
  0xb7   : > { %v401_v51 = vadd.f32 %v389_v50, %v374_v38  ;;  %v404_v52 = vadd.f32 %v389_v50, %v377_v39  ;;  %v407_v53 = vadd.f32 %v389_v50, %v380_v40  ;;  %v410_v54 = vadd.f32 %v389_v50, %v383_v41  ;;  %v467_v55 = vpop.permute.xlu1 %466 }
  0xb8   : > { %v493_v56 = vmul.f32 %v2175_v34, %v467_v55  ;;  %v496_v57 = vmul.f32 %v2178_v35, %v467_v55  ;;  %v499_v58 = vmul.f32 %v2181_v36, %v467_v55  ;;  %v502_v59 = vmul.f32 %v2184_v37, %v467_v55 }
  0xb9   : > { %v453_v60 = vadd.f32 %v441_v46, %v401_v51  ;;  %v456_v61 = vadd.f32 %v444_v47, %v404_v52  ;;  %v459_v62 = vadd.f32 %v447_v48, %v407_v53  ;;  %v462_v63 = vadd.f32 %v450_v49, %v410_v54 }
  0xbb   : > { %v505_v0 = vadd.f32 %v493_v56, %v453_v60  ;;  %v508_v1 = vadd.f32 %v496_v57, %v456_v61  ;;  %v511_v2 = vadd.f32 %v499_v58, %v459_v62  ;;  %v514_v3 = vadd.f32 %v502_v59, %v462_v63  ;;  %v519_v4 = vpop.permute.xlu0 %518 }
  0xbc   : > { %v545_v5 = vmul.f32 %v2191_v42, %v519_v4  ;;  %v548_v6 = vmul.f32 %v2194_v43, %v519_v4  ;;  %v551_v7 = vmul.f32 %v2197_v44, %v519_v4  ;;  %v554_v8 = vmul.f32 %v2200_v45, %v519_v4  ;;  %v351_v9 = vpop.permute.xlu1 %350 }
  0xbd   : > { %v375_v21 = vmul.f32 %v2148_v23, %v351_v9  ;;  %v378_v28 = vmul.f32 %v2151_v24, %v351_v9  ;;  %v381_v33 = vmul.f32 %v2154_v25, %v351_v9  ;;  %v384_v38 = vmul.f32 %v2157_v26, %v351_v9 }
  0xbe   : > { %v2226_v14 = vadd.f32 %v545_v5, %v505_v0  ;;  %v2228_v18 = vadd.f32 %v548_v6, %v508_v1  ;;  %v2230_v19 = vadd.f32 %v551_v7, %v511_v2  ;;  %v2232_v20 = vadd.f32 %v554_v8, %v514_v3 }
  0xc0   : > { %v394_v15 = vpop.permute.xlu1 %393  ;;  %v419_v39 = vpop.permute.xlu0 %418  ;;  %v609_v40 = vrot.slane %v2226_v14, %v2140_v17  ;;  %v613_v41 = vrot.slane %v2228_v18, %v2140_v17  ;;  %v617_v46 = vrot.slane %v2230_v19, %v2140_v17  ;;  %v621_v47 = vrot.slane %v2232_v20, %v2140_v17 }
  0xc1   : > { %v402_v48 = vadd.f32 %v394_v15, %v375_v21  ;;  %v405_v49 = vadd.f32 %v394_v15, %v378_v28  ;;  %v408_v50 = vadd.f32 %v394_v15, %v381_v33  ;;  %v411_v51 = vadd.f32 %v394_v15, %v384_v38 }
  0xc2   : > { %v442_v52 = vmul.f32 %v2163_v29, %v419_v39  ;;  %v445_v53 = vmul.f32 %v2166_v30, %v419_v39  ;;  %v448_v54 = vmul.f32 %v2169_v31, %v419_v39  ;;  %v451_v55 = vmul.f32 %v2172_v32, %v419_v39 }
  0xc3   : > { %v622_v56 = vrot.slane %v2226_v14, 1  ;;  %v624_v57 = vrot.slane %v2230_v19, 7  ;;  %v626_v58 = vrot.slane %v2232_v20, 6  ;;  %v2255_v59 = vmul.f32 %v2226_v14, %v2226_v14 }
  0xc4   : > { %v454_v60 = vadd.f32 %v442_v52, %v402_v48  ;;  %v457_v61 = vadd.f32 %v445_v53, %v405_v49  ;;  %v460_v62 = vadd.f32 %v448_v54, %v408_v50  ;;  %v463_v63 = vadd.f32 %v451_v55, %v411_v51 }
  0xc5   : > { %v471_v0 = vpop.permute.xlu1 %470  ;;  %v356_v1 = vpop.permute.xlu0 %355  ;;  %v623_v2 = vsel %vm574_vm0, %v2228_v18, %v622_v56  ;;  %v2261_v3 = vmul.f32 %v2228_v18, %v2228_v18  ;;  %v2265_v4 = vmul.f32 %v2230_v19, %v2230_v19  ;;  %v2269_v5 = vmul.f32 %v2232_v20, %v2232_v20 }
  0xc6   : > { %v494_v6 = vmul.f32 %v2175_v34, %v471_v0  ;;  %v497_v7 = vmul.f32 %v2178_v35, %v471_v0  ;;  %v500_v8 = vmul.f32 %v2181_v36, %v471_v0  ;;  %v503_v9 = vmul.f32 %v2184_v37, %v471_v0 }
  0xc7   : > { %v376_v21 = vmul.f32 %v2148_v23, %v356_v1  ;;  %v379_v28 = vmul.f32 %v2151_v24, %v356_v1  ;;  %v382_v33 = vmul.f32 %v2154_v25, %v356_v1  ;;  %v385_v38 = vmul.f32 %v2157_v26, %v356_v1 }
  0xc8   : > { %v506_v15 = vadd.f32 %v494_v6, %v454_v60  ;;  %v509_v39 = vadd.f32 %v497_v7, %v457_v61  ;;  %v512_v48 = vadd.f32 %v500_v8, %v460_v62  ;;  %v515_v49 = vadd.f32 %v503_v9, %v463_v63 }
  0xc9   : > { %v625_v50 = vsel %vm577_vm1, %v624_v57, %v623_v2  ;;  %v648_v51 = vrot.slane %v2226_v14, %v2145_v22  ;;  %v652_v52 = vrot.slane %v2228_v18, %v2145_v22  ;;  %v656_v23 = vrot.slane %v2230_v19, %v2145_v22 }
  0xca   : > { %v523_v24 = vpop.permute.xlu1 %522  ;;  %v475_v53 = vpop.permute.xlu0 %474  ;;  %v627_v25 = vsel %vm580_vm2, %v626_v58, %v625_v50  ;;  %v660_v26 = vrot.slane %v2232_v20, %v2145_v22  ;;  %v661_v54 = vrot.slane %v2226_v14, 2  ;;  %v662_v55 = vrot.slane %v2228_v18, 1 }
  0xcb   : > { %v546_v56 = vmul.f32 %v2191_v42, %v523_v24  ;;  %v549_v57 = vmul.f32 %v2194_v43, %v523_v24  ;;  %v552_v60 = vmul.f32 %v2197_v44, %v523_v24  ;;  %v555_v61 = vmul.f32 %v2200_v45, %v523_v24 }
  0xcc   : > { %v495_v62 = vmul.f32 %v2175_v34, %v475_v53  ;;  %v498_v63 = vmul.f32 %v2178_v35, %v475_v53  ;;  %v501_v58 = vmul.f32 %v2181_v36, %v475_v53  ;;  %v504_v0 = vmul.f32 %v2184_v37, %v475_v53 }
  0xcd   : > { %v2299_v1 = vadd.f32 %v546_v56, %v506_v15  ;;  %v2301_v2 = vadd.f32 %v549_v57, %v509_v39  ;;  %v2303_v6 = vadd.f32 %v552_v60, %v512_v48  ;;  %v2305_v7 = vadd.f32 %v555_v61, %v515_v49 }
  0xce   : > { %v629_v8 = vmul.f32 %v627_v25, %v609_v40  ;;  %v630_v9 = vmul.f32 %v627_v25, %v613_v41  ;;  %v631_v50 = vmul.f32 %v627_v25, %v617_v46  ;;  %v632_v24 = vmul.f32 %v627_v25, %v621_v47 }
  0xcf   : > { %2970 = vst [vmem:[#allocation18_spill] sm:$0xff] %v2303_v6  ;;  %2971 = vst [vmem:[#allocation19_spill] sm:$0xff] %v2305_v7  ;;  %v399_v22 = vpop.permute.xlu1 %398  ;;  %v663_v34 = vsel %vm574_vm0, %v662_v55, %v661_v54  ;;  %v665_v35 = vrot.slane %v2232_v20, 7  ;;  %v680_v36 = vrot.slane %v2255_v59, 1  ;;  %v681_v37 = vrot.slane %v2261_v3, 1 }
  0xd0   : > { %v403_v15 = vadd.f32 %v399_v22, %v376_v21  ;;  %v406_v39 = vadd.f32 %v399_v22, %v379_v28  ;;  %v409_v53 = vadd.f32 %v399_v22, %v382_v33  ;;  %v412_v48 = vadd.f32 %v399_v22, %v385_v38 }
  0xd1   : > { %v664_v49 = vsel %vm577_vm1, %v2230_v19, %v663_v34  ;;  %v682_v40 = vrot.slane %v2265_v4, 1  ;;  %v683_v41 = vrot.slane %v2269_v5, 1  ;;  %v688_v46 = vadd.f32 %v680_v36, %v2255_v59 }
  0xd2   : > { %v666_v47 = vsel %vm580_vm2, %v665_v35, %v664_v49  ;;  %v689_v25 = vadd.f32 %v681_v37, %v2261_v3  ;;  %v695_v54 = vrot.slane %v2226_v14, %v2160_v27  ;;  %v699_v21 = vrot.slane %v2228_v18, %v2160_v27 }
  0xd3   : > { %v668_v22 = vmul.f32 %v666_v47, %v648_v51  ;;  %v669_v28 = vmul.f32 %v666_v47, %v652_v52  ;;  %v670_v33 = vmul.f32 %v666_v47, %v656_v23  ;;  %v671_v38 = vmul.f32 %v666_v47, %v660_v26 }
  0xd4   : > { %v423_v55 = vpop.permute.xlu1 %422  ;;  %v690_v56 = vadd.f32 %v682_v40, %v2265_v4  ;;  %v691_v57 = vadd.f32 %v683_v41, %v2269_v5  ;;  %v703_v60 = vrot.slane %v2230_v19, %v2160_v27  ;;  %v707_v61 = vrot.slane %v2232_v20, %v2160_v27 }
  0xd5   : > { %v443_v34 = vmul.f32 %v2163_v29, %v423_v55  ;;  %v446_v35 = vmul.f32 %v2166_v30, %v423_v55  ;;  %v449_v51 = vmul.f32 %v2169_v31, %v423_v55  ;;  %v452_v52 = vmul.f32 %v2172_v32, %v423_v55 }
  0xd6   : > { %v672_v23 = vadd.f32 %v668_v22, %v629_v8  ;;  %v673_v26 = vadd.f32 %v669_v28, %v630_v9  ;;  %v674_v36 = vadd.f32 %v670_v33, %v631_v50  ;;  %v675_v37 = vadd.f32 %v671_v38, %v632_v24 }
  0xd7   : > { %v455_v49 = vadd.f32 %v443_v34, %v403_v15  ;;  %v458_v40 = vadd.f32 %v446_v35, %v406_v39  ;;  %v461_v41 = vadd.f32 %v449_v51, %v409_v53  ;;  %v464_v47 = vadd.f32 %v452_v52, %v412_v48 }
  0xd8   : > { %v708_v17 = vrot.slane %v2226_v14, 3  ;;  %v709_v27 = vrot.slane %v2228_v18, 2  ;;  %v711_v29 = vrot.slane %v2230_v19, 1  ;;  %v723_v30 = vrot.slane %v2255_v59, 2 }
  0xd9   : > { %v507_v7 = vadd.f32 %v495_v62, %v455_v49  ;;  %v510_v31 = vadd.f32 %v498_v63, %v458_v40  ;;  %v513_v6 = vadd.f32 %v501_v58, %v461_v41  ;;  %v516_v32 = vadd.f32 %v504_v0, %v464_v47  ;;  %v527_v8 = vpop.permute.xlu1 %526 }
  0xda   : > { %v547_v9 = vmul.f32 %v2191_v42, %v527_v8  ;;  %v550_v50 = vmul.f32 %v2194_v43, %v527_v8  ;;  %v553_v24 = vmul.f32 %v2197_v44, %v527_v8  ;;  %v556_v15 = vmul.f32 %v2200_v45, %v527_v8 }
  0xdb   : > { %v710_v39 = vsel %vm574_vm0, %v709_v27, %v708_v17  ;;  %v724_v53 = vrot.slane %v2261_v3, 2  ;;  %v725_v48 = vrot.slane %v2265_v4, 2  ;;  %v726_v62 = vrot.slane %v2269_v5, 2 }
  0xdc   : > { %v2344_v63 = vadd.f32 %v547_v9, %v507_v7  ;;  %v2346_v58 = vadd.f32 %v550_v50, %v510_v31  ;;  %v2348_v0 = vadd.f32 %v553_v24, %v513_v6  ;;  %v2350_v42 = vadd.f32 %v556_v15, %v516_v32 }
  0xdd   : > { %v712_v43 = vsel %vm577_vm1, %v711_v29, %v710_v39  ;;  %v731_v44 = vadd.f32 %v723_v30, %v688_v46  ;;  %v732_v45 = vadd.f32 %v724_v53, %v689_v25  ;;  %v733_v22 = vadd.f32 %v725_v48, %v690_v56 }
  0xde   : > { %v588_v17 = vrot.slane %v2346_v58, 7  ;;  %v598_v7 = vmul.f32 1.442695, %v2344_v63  ;;  %v600_v33 = vmul.f32 1.442695, %v2346_v58  ;;  %v713_v55 = vsel %vm580_vm2, %v2232_v20, %v712_v43 }
  0xdf   : > { %v602_v6 = vmul.f32 1.442695, %v2348_v0  ;;  %v604_v38 = vmul.f32 1.442695, %v2350_v42  ;;  %v715_v46 = vmul.f32 %v713_v55, %v695_v54  ;;  %v716_v25 = vmul.f32 %v713_v55, %v699_v21 }
  0xe0   : > { %1851 = vpow2.f32 %v598_v7  ;;  %v717_v56 = vmul.f32 %v713_v55, %v703_v60  ;;  %v718_v34 = vmul.f32 %v713_v55, %v707_v61  ;;  %v734_v35 = vadd.f32 %v726_v62, %v691_v57 }
  0xe1   : > { %1853 = vpow2.f32 %v600_v33  ;;  %v738_v51 = vrot.slane %v2226_v14, %v2215_v10  ;;  %v719_v52 = vadd.f32 %v715_v46, %v672_v23  ;;  %v720_v49 = vadd.f32 %v716_v25, %v673_v26 }
  0xe2   : > { %1855 = vpow2.f32 %v602_v6  ;;  %v721_v40 = vadd.f32 %v717_v56, %v674_v36  ;;  %v722_v41 = vadd.f32 %v718_v34, %v675_v37  ;;  %v742_v47 = vrot.slane %v2228_v18, %v2215_v10 }
  0xe3   : > { %1857 = vpow2.f32 %v604_v38  ;;  %v746_v54 = vrot.slane %v2230_v19, %v2215_v10  ;;  %v750_v21 = vrot.slane %v2232_v20, %v2215_v10  ;;  %v751_v57 = vrot.slane %v2226_v14, 4 }
  0xe4   : > { %v752_v60 = vrot.slane %v2228_v18, 3  ;;  %v754_v61 = vrot.slane %v2230_v19, 2  ;;  %v756_v23 = vrot.slane %v2232_v20, 1  ;;  %v767_v26 = vrot.slane %v2255_v59, 3 }
  0xe5   : > { %v768_v36 = vrot.slane %v2261_v3, 3  ;;  %v769_v37 = vrot.slane %v2265_v4, 3  ;;  %v770_v30 = vrot.slane %v2269_v5, 3  ;;  %v782_v31 = vrot.slane %v2226_v14, %v2218_v11 }
  0xe6   : > { %v753_v29 = vsel %vm574_vm0, %v752_v60, %v751_v57  ;;  %v786_v32 = vrot.slane %v2228_v18, %v2218_v11  ;;  %v775_v9 = vadd.f32 %v767_v26, %v731_v44  ;;  %v790_v53 = vrot.slane %v2230_v19, %v2218_v11 }
  0xe7   : > { %v755_v8 = vsel %vm577_vm1, %v754_v61, %v753_v29  ;;  %v776_v50 = vadd.f32 %v768_v36, %v732_v45  ;;  %v777_v24 = vadd.f32 %v769_v37, %v733_v22  ;;  %v778_v39 = vadd.f32 %v770_v30, %v734_v35 }
  0xe8   : > { %v757_v15 = vsel %vm580_vm2, %v756_v23, %v755_v8  ;;  %v794_v48 = vrot.slane %v2232_v20, %v2218_v11  ;;  %v795_v6 = vrot.slane %v2226_v14, 5  ;;  %v796_v38 = vrot.slane %v2228_v18, 4 }
  0xe9   : > { %v759_v62 = vmul.f32 %v757_v15, %v738_v51  ;;  %v760_v43 = vmul.f32 %v757_v15, %v742_v47  ;;  %v761_v7 = vmul.f32 %v757_v15, %v746_v54  ;;  %v762_v33 = vmul.f32 %v757_v15, %v750_v21 }
  0xea   : > { %v798_v44 = vrot.slane %v2230_v19, 3  ;;  %v800_v45 = vrot.slane %v2232_v20, 2  ;;  %v797_v56 = vsel %vm574_vm0, %v796_v38, %v795_v6  ;;  %v811_v34 = vrot.slane %v2255_v59, 4 }
  0xeb   : > { %v763_v22 = vadd.f32 %v759_v62, %v719_v52  ;;  %v764_v55 = vadd.f32 %v760_v43, %v720_v49  ;;  %v765_v46 = vadd.f32 %v761_v7, %v721_v40  ;;  %v766_v25 = vadd.f32 %v762_v33, %v722_v41 }
  0xec   : > { %v812_v35 = vrot.slane %v2261_v3, 4  ;;  %v813_v51 = vrot.slane %v2265_v4, 4  ;;  %v799_v54 = vsel %vm577_vm1, %v798_v44, %v797_v56  ;;  %v814_v21 = vrot.slane %v2269_v5, 4 }
  0xed   : > { %v2397_v47 = vpop.eup %1851  ;;  %v826_v52 = vrot.slane %v2226_v14, %v2221_v12  ;;  %v830_v49 = vrot.slane %v2228_v18, %v2221_v12  ;;  %v801_v41 = vsel %vm580_vm2, %v800_v45, %v799_v54  ;;  %v819_v57 = vadd.f32 %v811_v34, %v775_v9 }
  0xee   : > { %v2405_v40 = vpop.eup %1853  ;;  %v820_v60 = vadd.f32 %v812_v35, %v776_v50  ;;  %v821_v61 = vadd.f32 %v813_v51, %v777_v24  ;;  %v803_v26 = vmul.f32 %v801_v41, %v782_v31  ;;  %v804_v36 = vmul.f32 %v801_v41, %v786_v32 }
  0xef   : > { %v2408_v23 = vpop.eup %1855  ;;  %v805_v37 = vmul.f32 %v801_v41, %v790_v53  ;;  %v806_v29 = vmul.f32 %v801_v41, %v794_v48  ;;  %v822_v8 = vadd.f32 %v814_v21, %v778_v39  ;;  %v834_v15 = vrot.slane %v2230_v19, %v2221_v12 }
  0xf0   : > { %v2410_v30 = vpop.eup %1857  ;;  %v838_v62 = vrot.slane %v2232_v20, %v2221_v12  ;;  %v839_v43 = vrot.slane %v2226_v14, 6  ;;  %v807_v9 = vadd.f32 %v803_v26, %v763_v22  ;;  %v808_v50 = vadd.f32 %v804_v36, %v764_v55 }
  0xf1   : > { %v809_v24 = vadd.f32 %v805_v37, %v765_v46  ;;  %v810_v7 = vadd.f32 %v806_v29, %v766_v25  ;;  %v840_v31 = vrot.slane %v2228_v18, 5  ;;  %v842_v32 = vrot.slane %v2230_v19, 4 }
  0xf2   : > { %v844_v53 = vrot.slane %v2232_v20, 3  ;;  %v855_v39 = vrot.slane %v2255_v59, 5  ;;  %v856_v48 = vrot.slane %v2261_v3, 5  ;;  %v857_v33 = vrot.slane %v2265_v4, 5 }
  0xf3   : > { %v858_v6 = vrot.slane %v2269_v5, 5  ;;  %v870_v38 = vrot.slane %v2226_v14, %v2224_v13  ;;  %v841_v44 = vsel %vm574_vm0, %v840_v31, %v839_v43  ;;  %v874_v22 = vrot.slane %v2228_v18, %v2224_v13 }
  0xf4   : > { %v863_v45 = vadd.f32 %v855_v39, %v819_v57  ;;  %v878_v55 = vrot.slane %v2230_v19, %v2224_v13  ;;  %v843_v46 = vsel %vm577_vm1, %v842_v32, %v841_v44  ;;  %v864_v25 = vadd.f32 %v856_v48, %v820_v60 }
  0xf5   : > { %v865_v56 = vadd.f32 %v857_v33, %v821_v61  ;;  %v866_v34 = vadd.f32 %v858_v6, %v822_v8  ;;  %v845_v35 = vsel %vm580_vm2, %v844_v53, %v843_v46  ;;  %v882_v51 = vrot.slane %v2232_v20, %v2224_v13 }
  0xf6   : > { %v883_v54 = vrot.slane %v2226_v14, 7  ;;  %v884_v21 = vrot.slane %v2228_v18, 6  ;;  %v847_v41 = vmul.f32 %v845_v35, %v826_v52  ;;  %v848_v57 = vmul.f32 %v845_v35, %v830_v49 }
  0xf7   : > { %v849_v26 = vmul.f32 %v845_v35, %v834_v15  ;;  %v850_v36 = vmul.f32 %v845_v35, %v838_v62  ;;  %v886_v29 = vrot.slane %v2230_v19, 5  ;;  %v888_v60 = vrot.slane %v2232_v20, 4 }
  0xf8   : > { %v885_v37 = vsel %vm574_vm0, %v884_v21, %v883_v54  ;;  %v899_v61 = vrot.slane %v2255_v59, 6  ;;  %v851_v8 = vadd.f32 %v847_v41, %v807_v9  ;;  %v852_v43 = vadd.f32 %v848_v57, %v808_v50  ;;  %v2973_v54 = vld [vmem:[#allocation19_spill] sm:$0xff] }
  0xf9   : > { %v853_v31 = vadd.f32 %v849_v26, %v809_v24  ;;  %v854_v32 = vadd.f32 %v850_v36, %v810_v7  ;;  %v887_v53 = vsel %vm577_vm1, %v886_v29, %v885_v37  ;;  %v900_v39 = vrot.slane %v2261_v3, 6  ;;  %v2974_v57 = vld [vmem:[#allocation15_spill] sm:$0xff] }
  0xfa   : > { %v901_v52 = vrot.slane %v2265_v4, 6  ;;  %v902_v49 = vrot.slane %v2269_v5, 6  ;;  %v889_v15 = vsel %vm580_vm2, %v888_v60, %v887_v53  ;;  %v907_v62 = vadd.f32 %v899_v61, %v863_v45  ;;  %v2972_v4 = vld [vmem:[#allocation18_spill] sm:$0xff] }
  0xfb   : > { %v914_v48 = vrot.slane %v2299_v1, %v2137_v16  ;;  %v918_v59 = vrot.slane %v2301_v2, %v2137_v16  ;;  %v891_v9 = vmul.f32 %v889_v15, %v870_v38  ;;  %v892_v50 = vmul.f32 %v889_v15, %v874_v22 }
  0xfc   : > { %v893_v24 = vmul.f32 %v889_v15, %v878_v55  ;;  %v894_v7 = vmul.f32 %v889_v15, %v882_v51  ;;  %v908_v33 = vadd.f32 %v900_v39, %v864_v25  ;;  %v909_v6 = vadd.f32 %v901_v52, %v865_v56 }
  0xfd   : > { %v910_v3 = vadd.f32 %v902_v49, %v866_v34  ;;  %v922_v44 = vrot.slane %v2972_v4, %v2137_v16  ;;  %v895_v5 = vadd.f32 %v891_v9, %v851_v8  ;;  %v896_v46 = vadd.f32 %v892_v50, %v852_v43 }
  0xfe   : > { %v897_v35 = vadd.f32 %v893_v24, %v853_v31  ;;  %v898_v45 = vadd.f32 %v894_v7, %v854_v32  ;;  %v926_v21 = vrot.slane %v2973_v54, %v2137_v16  ;;  %v931_v41 = vrot.slane %v2301_v2, 7 }
  0xff   : > { %v933_v38 = vrot.slane %v2972_v4, 6  ;;  %v935_v22 = vrot.slane %v2973_v54, 5  ;;  %v2459_v55 = vmul.f32 %v2299_v1, %v2299_v1  ;;  %v2463_v25 = vmul.f32 %v2301_v2, %v2301_v2 }
 0x100   : > { %v2467_v56 = vmul.f32 %v2972_v4, %v2972_v4  ;;  %v2471_v34 = vmul.f32 %v2973_v54, %v2973_v54  ;;  %v932_v51 = vsel %vm574_vm0, %v931_v41, %v2299_v1  ;;  %v969_v26 = vrot.slane %v2299_v1, %v2974_v57 }
 0x101   : > { %v973_v36 = vrot.slane %v2301_v2, %v2974_v57  ;;  %v977_v37 = vrot.slane %v2972_v4, %v2974_v57  ;;  %v934_v29 = vsel %vm577_vm1, %v933_v38, %v932_v51  ;;  %v954_v60 = vrot.slane %v2459_v55, 7 }
 0x102   : > { %v955_v61 = vrot.slane %v2463_v25, 7  ;;  %v956_v8 = vrot.slane %v2467_v56, 7  ;;  %v936_v43 = vsel %vm580_vm2, %v935_v22, %v934_v29  ;;  %v957_v31 = vrot.slane %v2471_v34, 7 }
 0x103   : > { %v981_v32 = vrot.slane %v2973_v54, %v2974_v57  ;;  %v982_v53 = vrot.slane %v2299_v1, 1  ;;  %v938_v39 = vmul.f32 %v936_v43, %v914_v48  ;;  %v939_v52 = vmul.f32 %v936_v43, %v918_v59 }
 0x104   : > { %v940_v49 = vmul.f32 %v936_v43, %v922_v44  ;;  %v941_v15 = vmul.f32 %v936_v43, %v926_v21  ;;  %v962_v9 = vadd.f32 %v954_v60, %v907_v62  ;;  %v963_v50 = vadd.f32 %v955_v61, %v908_v33 }
 0x105   : > { %v964_v24 = vadd.f32 %v956_v8, %v909_v6  ;;  %v965_v7 = vadd.f32 %v957_v31, %v910_v3  ;;  %v942_v41 = vadd.f32 %v938_v39, %v895_v5  ;;  %v943_v38 = vadd.f32 %v939_v52, %v896_v46  ;;  %v2975_v6 = vld [vmem:[#allocation16_spill] sm:$0xff] }
 0x106   : > { %v944_v51 = vadd.f32 %v940_v49, %v897_v35  ;;  %v945_v28 = vadd.f32 %v941_v15, %v898_v45  ;;  %v983_v22 = vsel %vm574_vm0, %v2301_v2, %v982_v53  ;;  %v984_v29 = vrot.slane %v2972_v4, 7 }
 0x107   : > { %v986_v27 = vrot.slane %v2973_v54, 6  ;;  %v997_v48 = vadd.f32 %v962_v9, %v2459_v55  ;;  %v998_v59 = vadd.f32 %v963_v50, %v2463_v25  ;;  %v999_v62 = vadd.f32 %v964_v24, %v2467_v56 }
 0x108   : > { %v1000_v33 = vadd.f32 %v965_v7, %v2471_v34  ;;  %v1004_v3 = vrot.slane %v2299_v1, %v2975_v6  ;;  %v985_v44 = vsel %vm577_vm1, %v984_v29, %v983_v22  ;;  %v1008_v5 = vrot.slane %v2301_v2, %v2975_v6  ;;  %v2976_v29 = vld [vmem:[#allocation17_spill] sm:$0xff] }
 0x109   : > { %v1012_v46 = vrot.slane %v2972_v4, %v2975_v6  ;;  %v1016_v35 = vrot.slane %v2973_v54, %v2975_v6  ;;  %v987_v45 = vsel %vm580_vm2, %v986_v27, %v985_v44  ;;  %v1017_v21 = vrot.slane %v2299_v1, 2 }
 0x10a   : > { %v1018_v60 = vrot.slane %v2301_v2, 1  ;;  %v1021_v61 = vrot.slane %v2973_v54, 7  ;;  %v989_v8 = vmul.f32 %v987_v45, %v969_v26  ;;  %v990_v43 = vmul.f32 %v987_v45, %v973_v36 }
 0x10b   : > { %v991_v31 = vmul.f32 %v987_v45, %v977_v37  ;;  %v992_v53 = vmul.f32 %v987_v45, %v981_v32  ;;  %v1032_v52 = vrot.slane %v2459_v55, 1  ;;  %v1033_v49 = vrot.slane %v2463_v25, 1 }
 0x10c   : > { %v1019_v39 = vsel %vm574_vm0, %v1018_v60, %v1017_v21  ;;  %v1034_v15 = vrot.slane %v2467_v56, 1  ;;  %v993_v9 = vadd.f32 %v989_v8, %v942_v41  ;;  %v994_v27 = vadd.f32 %v990_v43, %v943_v38 }
 0x10d   : > { %v995_v50 = vadd.f32 %v991_v31, %v944_v51  ;;  %v996_v24 = vadd.f32 %v992_v53, %v945_v28  ;;  %v1020_v7 = vsel %vm577_vm1, %v2972_v4, %v1019_v39  ;;  %v1035_v26 = vrot.slane %v2471_v34, 1 }
 0x10e   : > { %v1040_v36 = vadd.f32 %v1032_v52, %v997_v48  ;;  %v1041_v37 = vadd.f32 %v1033_v49, %v998_v59  ;;  %v1022_v32 = vsel %vm580_vm2, %v1021_v61, %v1020_v7  ;;  %v1042_v22 = vadd.f32 %v1034_v15, %v999_v62 }
 0x10f   : > { %v1047_v44 = vrot.slane %v2299_v1, %v2976_v29  ;;  %v1051_v45 = vrot.slane %v2301_v2, %v2976_v29  ;;  %v1024_v41 = vmul.f32 %v1022_v32, %v1004_v3  ;;  %v1025_v38 = vmul.f32 %v1022_v32, %v1008_v5 }
 0x110   : > { %v1026_v51 = vmul.f32 %v1022_v32, %v1012_v46  ;;  %v1027_v28 = vmul.f32 %v1022_v32, %v1016_v35  ;;  %v1043_v21 = vadd.f32 %v1035_v26, %v1000_v33  ;;  %v1055_v60 = vrot.slane %v2972_v4, %v2976_v29 }
 0x111   : > { %v1059_v48 = vrot.slane %v2973_v54, %v2976_v29  ;;  %v1060_v59 = vrot.slane %v2299_v1, 3  ;;  %v1028_v62 = vadd.f32 %v1024_v41, %v993_v9  ;;  %v1029_v61 = vadd.f32 %v1025_v38, %v994_v27 }
 0x112   : > { %v1030_v8 = vadd.f32 %v1026_v51, %v995_v50  ;;  %v1031_v43 = vadd.f32 %v1027_v28, %v996_v24  ;;  %v1061_v31 = vrot.slane %v2301_v2, 2  ;;  %v1063_v3 = vrot.slane %v2972_v4, 1 }
 0x113   : > { %v1075_v5 = vrot.slane %v2459_v55, 2  ;;  %v1076_v33 = vrot.slane %v2463_v25, 2  ;;  %v1077_v46 = vrot.slane %v2467_v56, 2  ;;  %v1078_v35 = vrot.slane %v2471_v34, 2 }
 0x114   : > { %v1090_v53 = vrot.slane %v2299_v1, %v2215_v10  ;;  %v1094_v39 = vrot.slane %v2301_v2, %v2215_v10  ;;  %v1062_v52 = vsel %vm574_vm0, %v1061_v31, %v1060_v59  ;;  %v1098_v9 = vrot.slane %v2972_v4, %v2215_v10 }
 0x115   : > { %v1083_v49 = vadd.f32 %v1075_v5, %v1040_v36  ;;  %v1084_v15 = vadd.f32 %v1076_v33, %v1041_v37  ;;  %v1064_v27 = vsel %vm577_vm1, %v1063_v3, %v1062_v52  ;;  %v1085_v50 = vadd.f32 %v1077_v46, %v1042_v22 }
 0x116   : > { %v1086_v24 = vadd.f32 %v1078_v35, %v1043_v21  ;;  %v1102_v7 = vrot.slane %v2973_v54, %v2215_v10  ;;  %v1065_v26 = vsel %vm580_vm2, %v2973_v54, %v1064_v27  ;;  %v1103_v32 = vrot.slane %v2299_v1, 4 }
 0x117   : > { %v1104_v41 = vrot.slane %v2301_v2, 3  ;;  %v1106_v36 = vrot.slane %v2972_v4, 2  ;;  %v1067_v37 = vmul.f32 %v1065_v26, %v1047_v44  ;;  %v1068_v38 = vmul.f32 %v1065_v26, %v1051_v45 }
 0x118   : > { %v1069_v51 = vmul.f32 %v1065_v26, %v1055_v60  ;;  %v1070_v28 = vmul.f32 %v1065_v26, %v1059_v48  ;;  %v1108_v22 = vrot.slane %v2973_v54, 1  ;;  %v1119_v21 = vrot.slane %v2459_v55, 3 }
 0x119   : > { %v1105_v59 = vsel %vm574_vm0, %v1104_v41, %v1103_v32  ;;  %v1120_v31 = vrot.slane %v2463_v25, 3  ;;  %v1071_v3 = vadd.f32 %v1067_v37, %v1028_v62  ;;  %v1072_v5 = vadd.f32 %v1068_v38, %v1029_v61 }
 0x11a   : > { %v1073_v33 = vadd.f32 %v1069_v51, %v1030_v8  ;;  %v1074_v46 = vadd.f32 %v1070_v28, %v1031_v43  ;;  %v1107_v35 = vsel %vm577_vm1, %v1106_v36, %v1105_v59  ;;  %v1121_v52 = vrot.slane %v2467_v56, 3 }
 0x11b   : > { %v1122_v44 = vrot.slane %v2471_v34, 3  ;;  %v1127_v45 = vadd.f32 %v1119_v21, %v1083_v49  ;;  %v1109_v60 = vsel %vm580_vm2, %v1108_v22, %v1107_v35  ;;  %v1128_v48 = vadd.f32 %v1120_v31, %v1084_v15 }
 0x11c   : > { %v1134_v27 = vrot.slane %v2299_v1, %v2218_v11  ;;  %v1138_v26 = vrot.slane %v2301_v2, %v2218_v11  ;;  %v1111_v62 = vmul.f32 %v1109_v60, %v1090_v53  ;;  %v1112_v61 = vmul.f32 %v1109_v60, %v1094_v39 }
 0x11d   : > { %v1113_v8 = vmul.f32 %v1109_v60, %v1098_v9  ;;  %v1114_v43 = vmul.f32 %v1109_v60, %v1102_v7  ;;  %v1129_v32 = vadd.f32 %v1121_v52, %v1085_v50  ;;  %v1130_v41 = vadd.f32 %v1122_v44, %v1086_v24 }
 0x11e   : > { %v1142_v36 = vrot.slane %v2972_v4, %v2218_v11  ;;  %v1146_v49 = vrot.slane %v2973_v54, %v2218_v11  ;;  %v1115_v37 = vadd.f32 %v1111_v62, %v1071_v3  ;;  %v1116_v15 = vadd.f32 %v1112_v61, %v1072_v5 }
 0x11f   : > { %v1117_v38 = vadd.f32 %v1113_v8, %v1073_v33  ;;  %v1118_v51 = vadd.f32 %v1114_v43, %v1074_v46  ;;  %v1147_v28 = vrot.slane %v2299_v1, 5  ;;  %v1148_v59 = vrot.slane %v2301_v2, 4 }
 0x120   : > { %v1150_v53 = vrot.slane %v2972_v4, 3  ;;  %v1152_v39 = vrot.slane %v2973_v54, 2  ;;  %v1163_v9 = vrot.slane %v2459_v55, 4  ;;  %v1164_v50 = vrot.slane %v2463_v25, 4 }
 0x121   : > { %v1165_v24 = vrot.slane %v2467_v56, 4  ;;  %v1166_v11 = vrot.slane %v2471_v34, 4  ;;  %v1149_v7 = vsel %vm574_vm0, %v1148_v59, %v1147_v28  ;;  %v1178_v22 = vrot.slane %v2299_v1, %v2221_v12 }
 0x122   : > { %v1182_v21 = vrot.slane %v2301_v2, %v2221_v12  ;;  %v1186_v31 = vrot.slane %v2972_v4, %v2221_v12  ;;  %v1151_v3 = vsel %vm577_vm1, %v1150_v53, %v1149_v7  ;;  %v1171_v5 = vadd.f32 %v1163_v9, %v1127_v45 }
 0x123   : > { %v1172_v33 = vadd.f32 %v1164_v50, %v1128_v48  ;;  %v1173_v46 = vadd.f32 %v1165_v24, %v1129_v32  ;;  %v1153_v35 = vsel %vm580_vm2, %v1152_v39, %v1151_v3  ;;  %v1174_v52 = vadd.f32 %v1166_v11, %v1130_v41 }
 0x124   : > { %v1190_v44 = vrot.slane %v2973_v54, %v2221_v12  ;;  %v1191_v60 = vrot.slane %v2299_v1, 6  ;;  %v1155_v62 = vmul.f32 %v1153_v35, %v1134_v27  ;;  %v1156_v61 = vmul.f32 %v1153_v35, %v1138_v26 }
 0x125   : > { %v1157_v8 = vmul.f32 %v1153_v35, %v1142_v36  ;;  %v1158_v43 = vmul.f32 %v1153_v35, %v1146_v49  ;;  %v1192_v28 = vrot.slane %v2301_v2, 5  ;;  %v1194_v59 = vrot.slane %v2972_v4, 4 }
 0x126   : > { %v1196_v45 = vrot.slane %v2973_v54, 3  ;;  %v1207_v48 = vrot.slane %v2459_v55, 5  ;;  %v1159_v32 = vadd.f32 %v1155_v62, %v1115_v37  ;;  %v1160_v53 = vadd.f32 %v1156_v61, %v1116_v15 }
 0x127   : > { %v1161_v41 = vadd.f32 %v1157_v8, %v1117_v38  ;;  %v1162_v39 = vadd.f32 %v1158_v43, %v1118_v51  ;;  %v1193_v12 = vsel %vm574_vm0, %v1192_v28, %v1191_v60  ;;  %v1208_v9 = vrot.slane %v2463_v25, 5 }
 0x128   : > { %v1209_v27 = vrot.slane %v2467_v56, 5  ;;  %v1210_v26 = vrot.slane %v2471_v34, 5  ;;  %v1195_v36 = vsel %vm577_vm1, %v1194_v59, %v1193_v12  ;;  %v1215_v49 = vadd.f32 %v1207_v48, %v1171_v5 }
 0x129   : > { %v1222_v50 = vrot.slane %v2299_v1, %v2224_v13  ;;  %v1226_v37 = vrot.slane %v2301_v2, %v2224_v13  ;;  %v1197_v15 = vsel %vm580_vm2, %v1196_v45, %v1195_v36  ;;  %v1216_v38 = vadd.f32 %v1208_v9, %v1172_v33 }
 0x12a   : > { %v1217_v51 = vadd.f32 %v1209_v27, %v1173_v46  ;;  %v1218_v24 = vadd.f32 %v1210_v26, %v1174_v52  ;;  %v1199_v11 = vmul.f32 %v1197_v15, %v1178_v22  ;;  %v1200_v7 = vmul.f32 %v1197_v15, %v1182_v21 }
 0x12b   : > { %v1201_v3 = vmul.f32 %v1197_v15, %v1186_v31  ;;  %v1202_v35 = vmul.f32 %v1197_v15, %v1190_v44  ;;  %v1230_v60 = vrot.slane %v2972_v4, %v2224_v13  ;;  %v1234_v5 = vrot.slane %v2973_v54, %v2224_v13 }
 0x12c   : > { %v1235_v62 = vrot.slane %v2299_v1, 7  ;;  %v1236_v61 = vrot.slane %v2301_v2, 6  ;;  %v1203_v8 = vadd.f32 %v1199_v11, %v1159_v32  ;;  %v1204_v43 = vadd.f32 %v1200_v7, %v1160_v53 }
 0x12d   : > { %v1205_v28 = vadd.f32 %v1201_v3, %v1161_v41  ;;  %v1206_v33 = vadd.f32 %v1202_v35, %v1162_v39  ;;  %v1238_v22 = vrot.slane %v2972_v4, 5  ;;  %v1240_v21 = vrot.slane %v2973_v54, 4 }
 0x12e   : > { %v1237_v46 = vsel %vm574_vm0, %v1236_v61, %v1235_v62  ;;  %v1251_v31 = vrot.slane %v2459_v55, 6  ;;  %v1252_v52 = vrot.slane %v2463_v25, 6  ;;  %v1253_v13 = vrot.slane %v2467_v56, 6 }
 0x12f   : > { %v1254_v1 = vrot.slane %v2471_v34, 6  ;;  %v1266_v2 = vrot.slane %v2344_v63, %v2137_v16  ;;  %v1239_v44 = vsel %vm577_vm1, %v1238_v22, %v1237_v46  ;;  %v1270_v45 = vrot.slane %v2346_v58, %v2137_v16 }
 0x130   : > { %v1259_v59 = vadd.f32 %v1251_v31, %v1215_v49  ;;  %v1274_v4 = vrot.slane %v2348_v0, %v2137_v16  ;;  %v1241_v54 = vsel %vm580_vm2, %v1240_v21, %v1239_v44  ;;  %v1260_v55 = vadd.f32 %v1252_v52, %v1216_v38 }
 0x131   : > { %v1261_v25 = vadd.f32 %v1253_v13, %v1217_v51  ;;  %v1262_v48 = vadd.f32 %v1254_v1, %v1218_v24  ;;  %v1243_v56 = vmul.f32 %v1241_v54, %v1222_v50  ;;  %v1244_v32 = vmul.f32 %v1241_v54, %v1226_v37 }
 0x132   : > { %v1245_v34 = vmul.f32 %v1241_v54, %v1230_v60  ;;  %v1246_v53 = vmul.f32 %v1241_v54, %v1234_v5  ;;  %v1278_v41 = vrot.slane %v2350_v42, %v2137_v16  ;;  %v1279_v39 = vsel %vm574_vm0, %v588_v17, %v2344_v63 }
 0x133   : > { %v2628_v12 = vmul.f32 %v2344_v63, %v2344_v63  ;;  %v2632_v9 = vmul.f32 %v2346_v58, %v2346_v58  ;;  %v1247_v27 = vadd.f32 %v1243_v56, %v1203_v8  ;;  %v1248_v26 = vadd.f32 %v1244_v32, %v1204_v43 }
 0x134   : > { %v1249_v36 = vadd.f32 %v1245_v34, %v1205_v28  ;;  %v1250_v49 = vadd.f32 %v1246_v53, %v1206_v33  ;;  %v2977_v50 = vrot.slane %v2348_v0, 6  ;;  %v2639_v37 = vmul.f32 %v2348_v0, %v2348_v0 }
 0x135   : > { %v2643_v15 = vmul.f32 %v2350_v42, %v2350_v42  ;;  %v1299_v38 = vrot.slane %v2628_v12, 7  ;;  %v2978_v51 = vrot.slane %v2350_v42, 5  ;;  %v1300_v11 = vrot.slane %v2632_v9, 7 }
 0x136   : > { %v1280_v16 = vsel %vm577_vm1, %v2977_v50, %v1279_v39  ;;  %v1314_v7 = vrot.slane %v2344_v63, %v2974_v57  ;;  %v1318_v3 = vrot.slane %v2346_v58, %v2974_v57  ;;  %v1301_v61 = vrot.slane %v2639_v37, 7 }
 0x137   : > { %v1281_v24 = vsel %vm580_vm2, %v2978_v51, %v1280_v16  ;;  %v1302_v8 = vrot.slane %v2643_v15, 7  ;;  %v1307_v43 = vadd.f32 %v1299_v38, %v1259_v59  ;;  %v1308_v28 = vadd.f32 %v1300_v11, %v1260_v55 }
 0x138   : > { %v1283_v35 = vmul.f32 %v1281_v24, %v1266_v2  ;;  %v1284_v60 = vmul.f32 %v1281_v24, %v1270_v45  ;;  %v1285_v5 = vmul.f32 %v1281_v24, %v1274_v4  ;;  %v1286_v62 = vmul.f32 %v1281_v24, %v1278_v41 }
 0x139   : > { %v1309_v31 = vadd.f32 %v1301_v61, %v1261_v25  ;;  %v1310_v52 = vadd.f32 %v1302_v8, %v1262_v48  ;;  %v1322_v13 = vrot.slane %v2348_v0, %v2974_v57  ;;  %v1326_v1 = vrot.slane %v2350_v42, %v2974_v57 }
 0x13a   : > { %v1287_v33 = vadd.f32 %v1283_v35, %v1247_v27  ;;  %v1288_v46 = vadd.f32 %v1284_v60, %v1248_v26  ;;  %v1289_v22 = vadd.f32 %v1285_v5, %v1249_v36  ;;  %v1290_v21 = vadd.f32 %v1286_v62, %v1250_v49 }
 0x13b   : > { %v1327_v2 = vrot.slane %v2344_v63, 1  ;;  %v1329_v44 = vrot.slane %v2348_v0, 7  ;;  %v1331_v45 = vrot.slane %v2350_v42, 6  ;;  %v1342_v59 = vadd.f32 %v1307_v43, %v2628_v12 }
 0x13c   : > { %v1343_v4 = vadd.f32 %v1308_v28, %v2632_v9  ;;  %v1344_v54 = vadd.f32 %v1309_v31, %v2639_v37  ;;  %v1345_v55 = vadd.f32 %v1310_v52, %v2643_v15  ;;  %v1349_v25 = vrot.slane %v2344_v63, %v2975_v6 }
 0x13d   : > { %v1328_v57 = vsel %vm574_vm0, %v2346_v58, %v1327_v2  ;;  %v1353_v48 = vrot.slane %v2346_v58, %v2975_v6  ;;  %v1357_v56 = vrot.slane %v2348_v0, %v2975_v6  ;;  %v1361_v32 = vrot.slane %v2350_v42, %v2975_v6 }
 0x13e   : > { %v1330_v34 = vsel %vm577_vm1, %v1329_v44, %v1328_v57  ;;  %v1362_v53 = vrot.slane %v2344_v63, 2  ;;  %v1363_v41 = vrot.slane %v2346_v58, 1  ;;  %v1366_v39 = vrot.slane %v2350_v42, 7 }
 0x13f   : > { %v1332_v27 = vsel %vm580_vm2, %v1331_v45, %v1330_v34  ;;  %v1377_v26 = vrot.slane %v2628_v12, 1  ;;  %v1378_v36 = vrot.slane %v2632_v9, 1  ;;  %v1379_v49 = vrot.slane %v2639_v37, 1 }
 0x140   : > { %v1334_v50 = vmul.f32 %v1332_v27, %v1314_v7  ;;  %v1335_v16 = vmul.f32 %v1332_v27, %v1318_v3  ;;  %v1336_v38 = vmul.f32 %v1332_v27, %v1322_v13  ;;  %v1337_v6 = vmul.f32 %v1332_v27, %v1326_v1 }
 0x141   : > { %v1364_v51 = vsel %vm574_vm0, %v1363_v41, %v1362_v53  ;;  %v1380_v24 = vrot.slane %v2643_v15, 1  ;;  %v1385_v11 = vadd.f32 %v1377_v26, %v1342_v59  ;;  %v1386_v35 = vadd.f32 %v1378_v36, %v1343_v4 }
 0x142   : > { %v1338_v60 = vadd.f32 %v1334_v50, %v1287_v33  ;;  %v1339_v5 = vadd.f32 %v1335_v16, %v1288_v46  ;;  %v1340_v62 = vadd.f32 %v1336_v38, %v1289_v22  ;;  %v1341_v61 = vadd.f32 %v1337_v6, %v1290_v21 }
 0x143   : > { %v1365_v8 = vsel %vm577_vm1, %v2348_v0, %v1364_v51  ;;  %v1387_v43 = vadd.f32 %v1379_v49, %v1344_v54  ;;  %v1388_v28 = vadd.f32 %v1380_v24, %v1345_v55  ;;  %v1392_v7 = vrot.slane %v2344_v63, %v2976_v29 }
 0x144   : > { %v1367_v3 = vsel %vm580_vm2, %v1366_v39, %v1365_v8  ;;  %v1396_v31 = vrot.slane %v2346_v58, %v2976_v29  ;;  %v1400_v52 = vrot.slane %v2348_v0, %v2976_v29  ;;  %v1404_v33 = vrot.slane %v2350_v42, %v2976_v29 }
 0x145   : > { %v1369_v46 = vmul.f32 %v1367_v3, %v1349_v25  ;;  %v1370_v22 = vmul.f32 %v1367_v3, %v1353_v48  ;;  %v1371_v21 = vmul.f32 %v1367_v3, %v1357_v56  ;;  %v1372_v13 = vmul.f32 %v1367_v3, %v1361_v32 }
 0x146   : > { %v1405_v1 = vrot.slane %v2344_v63, 3  ;;  %v1406_v2 = vrot.slane %v2346_v58, 2  ;;  %v1408_v44 = vrot.slane %v2348_v0, 1  ;;  %v1420_v45 = vrot.slane %v2628_v12, 2 }
 0x147   : > { %v1373_v59 = vadd.f32 %v1369_v46, %v1338_v60  ;;  %v1374_v4 = vadd.f32 %v1370_v22, %v1339_v5  ;;  %v1375_v54 = vadd.f32 %v1371_v21, %v1340_v62  ;;  %v1376_v55 = vadd.f32 %v1372_v13, %v1341_v61 }
 0x148   : > { %v1407_v57 = vsel %vm574_vm0, %v1406_v2, %v1405_v1  ;;  %v1421_v29 = vrot.slane %v2632_v9, 2  ;;  %v1422_v25 = vrot.slane %v2639_v37, 2  ;;  %v1423_v48 = vrot.slane %v2643_v15, 2 }
 0x149   : > { %v1409_v56 = vsel %vm577_vm1, %v1408_v44, %v1407_v57  ;;  %v1428_v32 = vadd.f32 %v1420_v45, %v1385_v11  ;;  %v1435_v34 = vrot.slane %v2344_v63, %v2215_v10  ;;  %v1439_v53 = vrot.slane %v2346_v58, %v2215_v10 }
 0x14a   : > { %v1410_v41 = vsel %vm580_vm2, %v2350_v42, %v1409_v56  ;;  %v1429_v39 = vadd.f32 %v1421_v29, %v1386_v35  ;;  %v1430_v27 = vadd.f32 %v1422_v25, %v1387_v43  ;;  %v1431_v26 = vadd.f32 %v1423_v48, %v1388_v28 }
 0x14b   : > { %v1412_v36 = vmul.f32 %v1410_v41, %v1392_v7  ;;  %v1413_v49 = vmul.f32 %v1410_v41, %v1396_v31  ;;  %v1414_v50 = vmul.f32 %v1410_v41, %v1400_v52  ;;  %v1415_v16 = vmul.f32 %v1410_v41, %v1404_v33 }
 0x14c   : > { %v1443_v38 = vrot.slane %v2348_v0, %v2215_v10  ;;  %v1447_v6 = vrot.slane %v2350_v42, %v2215_v10  ;;  %v1448_v51 = vrot.slane %v2344_v63, 4  ;;  %v1449_v24 = vrot.slane %v2346_v58, 3 }
 0x14d   : > { %v1416_v11 = vadd.f32 %v1412_v36, %v1373_v59  ;;  %v1417_v35 = vadd.f32 %v1413_v49, %v1374_v4  ;;  %v1418_v60 = vadd.f32 %v1414_v50, %v1375_v54  ;;  %v1419_v5 = vadd.f32 %v1415_v16, %v1376_v55 }
 0x14e   : > { %v1450_v62 = vsel %vm574_vm0, %v1449_v24, %v1448_v51  ;;  %v1451_v61 = vrot.slane %v2348_v0, 2  ;;  %v1453_v8 = vrot.slane %v2350_v42, 1  ;;  %v1464_v10 = vrot.slane %v2628_v12, 3 }
 0x14f   : > { %v1465_v43 = vrot.slane %v2632_v9, 3  ;;  %v1466_v28 = vrot.slane %v2639_v37, 3  ;;  %v1467_v7 = vrot.slane %v2643_v15, 3  ;;  %v1484_v3 = vrot.slane %v2397_v47, 4 }
 0x150   : > { %v1452_v31 = vsel %vm577_vm1, %v1451_v61, %v1450_v62  ;;  %v1472_v52 = vadd.f32 %v1464_v10, %v1428_v32  ;;  %v1485_v33 = vrot.slane %v2405_v40, 4  ;;  %v1486_v12 = vrot.slane %v2408_v23, 4 }
 0x151   : > { %v1454_v46 = vsel %vm580_vm2, %v1453_v8, %v1452_v31  ;;  %v1473_v22 = vadd.f32 %v1465_v43, %v1429_v39  ;;  %v1474_v9 = vadd.f32 %v1466_v28, %v1430_v27  ;;  %v1475_v21 = vadd.f32 %v1467_v7, %v1431_v26 }
 0x152   : > { %v1456_v37 = vmul.f32 %v1454_v46, %v1435_v34  ;;  %v1457_v13 = vmul.f32 %v1454_v46, %v1439_v53  ;;  %v1458_v15 = vmul.f32 %v1454_v46, %v1443_v38  ;;  %v1459_v47 = vmul.f32 %v1454_v46, %v1447_v6 }
 0x153   : > { %v1476_v1 = vmul.f32 0.05, %v1472_v52  ;;  %v1477_v2 = vmul.f32 0.05, %v1473_v22  ;;  %v1478_v40 = vmul.f32 0.05, %v1474_v9 }
 0x154   : > { %v2979_v23 = vrot.slane %v2348_v0, 6  ;;  %v2980_v44 = vrot.slane %v2350_v42, 5  ;;  %v1460_v59 = vadd.f32 %v1456_v37, %v1416_v11  ;;  %v1461_v4 = vadd.f32 %v1457_v13, %v1417_v35 }
 0x155   : > { %v1462_v54 = vadd.f32 %v1458_v15, %v1418_v60  ;;  %v1463_v55 = vadd.f32 %v1459_v47, %v1419_v5  ;;  %v1479_v57 = vmul.f32 0.05, %v1475_v21  ;;  %v1487_v29 = vrot.slane %v2410_v30, 4 }
 0x156   : > { %v593_v45 = vsel %vm574_vm0, %v2980_v44, %v2979_v23  ;;  %v1492_v25 = vadd.f32 %v1484_v3, %v1476_v1  ;;  %v1493_v0 = vadd.f32 %v1485_v33, %v1477_v2  ;;  %v2761_v42 = vadd.f32 %v1486_v12, %v1478_v40 }
 0x157   : > { %597 = vst [vmem:[%s2749_s29 + $0x2] sm:$0x3] %v593_v45  ;;  %v1509_v48 = vmul.f32 0.05, %v1460_v59  ;;  %v1510_v56 = vmul.f32 0.05, %v1461_v4  ;;  %v2769_v32 = vadd.f32 %v1487_v29, %v1479_v57 }
 0x158   : > { %v1511_v30 = vmul.f32 0.05, %v1462_v54  ;;  %v1512_v34 = vmul.f32 0.05, %v1463_v55  ;;  %v573_v53 = vrot.slane %v2228_v18, 7  ;;  %v576_v41 = vrot.slane %v2230_v19, 6 }
 0x159   : > { %1513 = vst [vmem:[%s2729_s19] sm:$0xf] %v1509_v48  ;;  %1514 = vst [vmem:[%s2729_s19 + $0x4] sm:$0xf] %v1510_v56  ;;  %v1500_v39 = vrot.slane %v1493_v0, 7  ;;  %v1502_v18 = vrot.slane %v2761_v42, 6  ;;  %v579_v27 = vrot.slane %v2232_v20, 5  ;;  %v590_v20 = vsel %vm589_vm4, %v588_v17, %v2344_v63 }
 0x15a   : > { %1515 = vst [vmem:[%s2729_s19 + $0x8] sm:$0xf] %v1511_v30  ;;  %1516 = vst [vmem:[%s2729_s19 + $0xc] sm:$0xf] %v1512_v34  ;;  %v575_v19 = vsel %vm574_vm0, %v573_v53, %v2226_v14  ;;  %v1504_v36 = vrot.slane %v2769_v32, 5 }
 0x15b   : > { %1517 = vst [vmem:[%s2729_s19 - $0x1] sm:$0x2] %v1492_v25  ;;  %1763 = vst [vmem:[%s2729_s19 + $0x4] sm:$0x2] %v1493_v0  ;;  %v578_v26 = vsel %vm577_vm1, %v576_v41, %v575_v19  ;;  %v1501_v14 = vsel %vm577_vm1, %v1500_v39, %v1492_v25 }
 0x15c   : > { %1764 = vst [vmem:[%s2729_s19 + $0x9] sm:$0x2] %v2761_v42  ;;  %1765 = vst [vmem:[%s2729_s19 + $0xe] sm:$0x2] %v2769_v32  ;;  %s2824_s19 = scalar_lea.sflag [#allocation6], %s2981_s26 }
 0x15d   : > { %1872 = shalt.err (!%p1869_p5)
}
 0x15e   : > { %s1873_s25 = scalar_lea.hbm %s2767_s15, 256  ;;  %s1877_s2 = scalar_lea.hbm %s2942_s4, 512 }
 0x15f   : > { %p1874_p7 = scmp.ne.s32.totalorder %s2767_s15, %s1873_s25  ;;  %p1878_p12 = scmp.lt.s32.totalorder %s2767_s15, %s2942_s4 }
 0x160   : > { %p1879_p13 = scmp.lt.s32.totalorder %s1877_s2, %s1873_s25 }
 0x161   : > { %p1875_p10 = pnand %p1874_p7, %p2092_p6 }
 0x162   : > { %p1880_p0 = por %p1879_p13, %p1878_p12 }
 0x163   : > { %p1876_p11 = pneg %p1875_p10 }
 0x165   : > { %p1881_p1 = pnand %p1880_p0, %p1876_p11 }
 0x167   : > { %1884 = shalt.err (!%p1881_p1)
}
 0x168   : > { %s2012_s30 = smov 64   ;;  %s2013_s13 = smov 128   ;;  %v581_v63 = vsel %vm580_vm2, %v579_v27, %v578_v26  ;;  %v1503_v58 = vsel %vm580_vm2, %v1502_v18, %v1501_v14  ;;  %596 = vst [vmem:[%s2749_s29 - $0x6] sm:$0xc0] %v590_v20 }
 0x169   : > { %s2014_s0 = smov 4   ;;  %s2982_s23 = scalar_lea.vmem [#allocation3], %s2720_s17  ;;  %v1506_v17 = vsel %vm1505_vm3, %v1504_v36, %v1503_v58 }
 0x16a   : > { %1777 = dma.vmem_to_hbm [thread:$0]  (%p2092_p6), %s2759_s20, 256, %s2767_s15, %s2824_s19, %s2012_s30, %s2013_s13, %s2014_s0  }
 0x16b   : > { %583 = vst [vmem:[%s2982_s23] sm:$0xf] %v581_v63  ;;  %s1540_s25 = scalar_lea.sflag [#allocation9], %s2131_s14  ;;  %s1885_s18 = scalar_lea.vmem %s2804_s11, 64 }
 0x16c   : > { %p1886_p2 = scmp.ne.s32.totalorder %s2804_s11, %s1885_s18  ;;  %s2015_s28 = smov [#allocation8]  }
 0x16d   : > { %s1889_s2 = sshll.u32 %s2015_s28, 4  ;;  %s1890_s2 = int_to_ptr.vmem [resolvable:$false] %s1889_s2 }
 0x16e   : > { %p1887_p3 = pnand %p1886_p2, %p2092_p6  ;;  %s1891_s26 = scalar_lea.vmem %s1890_s2, 128 }
 0x16f   : > { %p1892_p5 = scmp.lt.s32.totalorder %s2804_s11, %s1890_s2  ;;  %p1893_p7 = scmp.lt.s32.totalorder %s1891_s26, %s1885_s18 }
 0x170   : > { %p1888_p4 = pneg %p1887_p3 }
 0x171   : > { %p1894_p10 = por %p1893_p7, %p1892_p5 }
 0x173   : > { %p1895_p11 = pnand %p1894_p10, %p1888_p4 }
 0x175   : > { %1898 = shalt.err (!%p1895_p11)
}
 0x176   : > { %s1899_s20 = scalar_lea.hbm %s2800_s16, 64  ;;  %s1903_s30 = scalar_lea.hbm %s2944_s6, 128 }
 0x177   : > { %p1900_p12 = scmp.ne.s32.totalorder %s2800_s16, %s1899_s20  ;;  %p1904_p1 = scmp.lt.s32.totalorder %s2800_s16, %s2944_s6 }
 0x178   : > { %p1905_p2 = scmp.lt.s32.totalorder %s1903_s30, %s1899_s20 }
 0x179   : > { %p1901_p13 = pnand %p1900_p12, %p2092_p6 }
 0x17a   : > { %p1906_p3 = por %p1905_p2, %p1904_p1 }
 0x17b   : > { %p1902_p0 = pneg %p1901_p13 }
 0x17d   : > { %p1907_p4 = pnand %p1906_p3, %p1902_p0 }
 0x17f   : > { %1910 = shalt.err (!%p1907_p4)
}
 0x180   : > { %1779 = dma.vmem_to_hbm [thread:$0]  (%p2092_p6), %s2804_s11, 64, %s2800_s16, %s1540_s25  }
 0x181   : > { %s1525_s23 = scalar_lea.sflag [#allocation4], %s2131_s14  ;;  %s1911_s18 = scalar_lea.vmem %s2785_s10, 64 }
 0x182   : > { %p1912_p5 = scmp.ne.s32.totalorder %s2785_s10, %s1911_s18  ;;  %s2016_s28 = smov [#allocation3]  }
 0x183   : > { %s1915_s2 = sshll.u32 %s2016_s28, 4  ;;  %s1916_s2 = int_to_ptr.vmem [resolvable:$false] %s1915_s2 }
 0x184   : > { %p1913_p7 = pnand %p1912_p5, %p2092_p6  ;;  %s1917_s26 = scalar_lea.vmem %s1916_s2, 128 }
 0x185   : > { %p1918_p11 = scmp.lt.s32.totalorder %s2785_s10, %s1916_s2  ;;  %p1919_p12 = scmp.lt.s32.totalorder %s1917_s26, %s1911_s18 }
 0x186   : > { %p1914_p10 = pneg %p1913_p7 }
 0x187   : > { %p1920_p13 = por %p1919_p12, %p1918_p11 }
 0x189   : > { %p1921_p0 = pnand %p1920_p13, %p1914_p10 }
 0x18b   : > { %1924 = shalt.err (!%p1921_p0)
}
 0x18c   : > { %s1925_s11 = scalar_lea.hbm %s2777_s9, 64  ;;  %s1929_s25 = scalar_lea.hbm %s2941_s3, 128 }
 0x18d   : > { %p1926_p1 = scmp.ne.s32.totalorder %s2777_s9, %s1925_s11  ;;  %p1930_p4 = scmp.lt.s32.totalorder %s2777_s9, %s2941_s3 }
 0x18e   : > { %p1931_p5 = scmp.lt.s32.totalorder %s1929_s25, %s1925_s11 }
 0x18f   : > { %p1927_p2 = pnand %p1926_p1, %p2092_p6 }
 0x190   : > { %p1932_p7 = por %p1931_p5, %p1930_p4 }
 0x191   : > { %p1928_p3 = pneg %p1927_p2 }
 0x193   : > { %p1933_p10 = pnand %p1932_p7, %p1928_p3 }
 0x195   : > { %1936 = shalt.err (!%p1933_p10)
}
 0x196   : > { %1776 = dma.vmem_to_hbm [thread:$0]  (%p2092_p6), %s2785_s10, 64, %s2777_s9, %s1525_s23  }
 0x197   : > { %s2983_s15 = scalar_lea.vmem [#allocation7], %s2720_s17  ;;  %s1937_s30 = scalar_lea.vmem %s2817_s12, 64 }
 0x198   : > { %1508 = vst [vmem:[%s2983_s15 - $0x1] sm:$0x1e] %v1506_v17  ;;  %p1938_p11 = scmp.ne.s32.totalorder %s2817_s12, %s1937_s30  ;;  %s2017_s13 = smov [#allocation7]  }
 0x199   : > { %s1941_s0 = sshll.u32 %s2017_s13, 4  ;;  %s1942_s0 = int_to_ptr.vmem [resolvable:$false] %s1941_s0 }
 0x19a   : > { %p1939_p12 = pnand %p1938_p11, %p2092_p6  ;;  %s1943_s18 = scalar_lea.vmem %s1942_s0, 128 }
 0x19b   : > { %p1944_p0 = scmp.lt.s32.totalorder %s2817_s12, %s1942_s0  ;;  %p1945_p1 = scmp.lt.s32.totalorder %s1943_s18, %s1937_s30 }
 0x19c   : > { %p1940_p13 = pneg %p1939_p12 }
 0x19d   : > { %p1946_p2 = por %p1945_p1, %p1944_p0 }
 0x19f   : > { %p1947_p3 = pnand %p1946_p2, %p1940_p13 }
 0x1a1   : > { %1950 = shalt.err (!%p1947_p3)
}
 0x1a2   : > { %s1951_s17 = scalar_lea.hbm %s2815_s1, 64  ;;  %s1955_s23 = scalar_lea.hbm %s2943_s5, 128 }
 0x1a3   : > { %p1952_p4 = scmp.ne.s32.totalorder %s2815_s1, %s1951_s17  ;;  %p1956_p10 = scmp.lt.s32.totalorder %s2815_s1, %s2943_s5 }
 0x1a4   : > { %p1957_p11 = scmp.lt.s32.totalorder %s1955_s23, %s1951_s17 }
 0x1a5   : > { %p1953_p5 = pnand %p1952_p4, %p2092_p6 }
 0x1a6   : > { %p1958_p12 = por %p1957_p11, %p1956_p10 }
 0x1a7   : > { %p1954_p7 = pneg %p1953_p5 }
 0x1a9   : > { %p1959_p13 = pnand %p1958_p12, %p1954_p7 }
 0x1ab   : > { %1962 = shalt.err (!%p1959_p13)
}
 0x1ac   : > { %1778 = dma.vmem_to_hbm [thread:$0]  (%p2092_p6), %s2817_s12, 64, %s2815_s1, %s2824_s19  }
 0x1ad PF: > { %s1606_s26 = sand.u32 1, %s1993_s21   ;;  %p1785_p0 = pnand %p1754_p9, %p2098_p8 }
 0x1ae   : > { %s1607_s11 = scalar_lea.sflag [#allocation4], %s1606_s26 }
 0x1af   : > { %p1786_p1 = pneg %p1785_p0 }
 0x1b1   : > { %1980 = dma.done.wait (%p1786_p1), %s1607_s11, 64  }
 0x1b2   : > { %1982 = vsyncadd (%p1786_p1), %s1607_s11, 4294967232  ;;  %s2984_s14 = sadd.s32 4294967294, %s2005_s24  }
 0x1b3   : > { %s1615_s16 = sand.u32 1, %s2984_s14  }
 0x1b4   : > { %s1616_s7 = scalar_lea.sflag [#allocation6], %s1615_s16 }
 0x1b5   : > { %1984 = dma.done.wait (%p1786_p1), %s1616_s7, 320  }
 0x1b6   : > { %1986 = vsyncadd (%p1786_p1), %s1616_s7, 4294966976  ;;  %s1634_s25 = scalar_lea.sflag [#allocation9], %s1606_s26 }
 0x1b7   : > { %1988 = dma.done.wait (%p1786_p1), %s1634_s25, 64  }
 0x1b8   : > { %1990 = vsyncadd (%p1786_p1), %s1634_s25, 4294967232  ;;  %s2985_s1 = sld [smem:[#allocation13_spill]]  ;;  %p23_p6 = scmp.ge.s32.totalorder %s2078_s27, 4  }
 0x1b9   : > { %s2986_s23 = sld [smem:[#allocation14_spill]]  ;;  %s2987_s21 = smov %s1997_s22 }
 0x1ba   : > { %s2989_s24 = smov %s2078_s27  ;;  %25 = sbr.rel (!%p23_p6) target bundleno = 11 (0xb), region = 165 }
 0x1be   : > { %s2988_s22 = smov %s2985_s1 }
 0x1bf   :  { %1639 = vsyncpa [#allocation4], 1 }
 0x1c0   :  { %1641 = vsyncpa [#allocation4 + $0x1], 1 }
 0x1c1   :  { %1642 = vsyncpa [#allocation6], 1 }
 0x1c2   :  { %1644 = vsyncpa [#allocation6 + $0x1], 1 }
 0x1c3   :  { %1645 = vsyncpa [#allocation9], 1 }
 0x1c4   :  { %1647 = vsyncpa [#allocation9 + $0x1], 1 }

</bundles_post_ra>
